<compile_context>
chip_gen: v7x
topology: tpu7x:2x2x1
jax: 0.10.0
libtpu: 0.0.40
codegen_flags: <defaults>
</compile_context>

<pallas_src>
import math
from functools import partial

import jax
import jax.numpy as jnp
from jax.experimental import pallas as pl
from jax.experimental.pallas import tpu as pltpu

# ----- small BERT config (bert-base structure at toy sizes) -----
VOCAB = 64
HIDDEN = 32
N_HEADS = 4
HEAD_DIM = HIDDEN // N_HEADS
INTER = 64
N_LAYERS = 2
MAX_POS = 16
LN_EPS = 1e-12


def _gelu(x):
    # TODO(synk): HF bert-base uses exact (erf) gelu; tanh approximation used
    # here since erf has no direct Mosaic lowering (numerically ~1e-3 close).
    c = math.sqrt(2.0 / math.pi)
    return 0.5 * x * (1.0 + jnp.tanh(c * (x + 0.044715 * x * x * x)))


# --------------------------- fused forward kernel ---------------------------

def _bert_fwd_kernel(
    ids_ref,                      # SMEM [B, S] int32 (scalar prefetch)
    word_emb_ref,                 # [VOCAB, HIDDEN]
    pos_type_ref,                 # [MAX_POS, HIDDEN]  (pos_emb + type_emb[0])
    emb_g_ref, emb_b_ref,         # [1, HIDDEN]
    wqkv_ref, bqkv_ref,           # [L, HIDDEN, 3H], [L, 1, 3H]  (Q pre-scaled)
    wo_ref, bo_ref,               # [L, HIDDEN, HIDDEN], [L, 1, HIDDEN]
    ln1_g_ref, ln1_b_ref,         # [L, 1, HIDDEN]
    w1_ref, b1_ref,               # [L, HIDDEN, INTER], [L, 1, INTER]
    w2_ref, b2_ref,               # [L, INTER, HIDDEN], [L, 1, HIDDEN]
    ln2_g_ref, ln2_b_ref,         # [L, 1, HIDDEN]
    qa_wt_ref, qa_b_ref,          # [2, HIDDEN], [2, 1]
    out_ref,                      # [1, 2, S]  (row 0 = start, row 1 = end)
    emb_scratch,                  # VMEM [S, HIDDEN]
    *, seq,
):
    b = pl.program_id(0)          # one batch element per grid step ("parallel")

    def ln(h, g, beta):
        mu = jnp.mean(h, axis=-1, keepdims=True)
        d = h - mu
        var = jnp.mean(d * d, axis=-1, keepdims=True)
        return d * jax.lax.rsqrt(var + LN_EPS) * g + beta

    # ---- in-kernel embedding gather + positional/type add + LN ----
    for s in range(seq):
        tok = ids_ref[b, s]                                   # SMEM scalar read
        emb_scratch[s:s + 1, :] = word_emb_ref[pl.ds(tok, 1), :]
    x = ln(emb_scratch[...] + pos_type_ref[0:seq, :],
           emb_g_ref[...], emb_b_ref[...])                    # [S, HIDDEN]

    for l in range(N_LAYERS):
        # ---- fused QKV projection (Q columns already carry 1/sqrt(d)) ----
        qkv = jnp.dot(x, wqkv_ref[l],
                      preferred_element_type=jnp.float32) + bqkv_ref[l]

        # head split: [S, HIDDEN] -> [H, S, D] (lane-layout-aware)
        q = pltpu.einshape(
            "shd->hsd", qkv[:, 0:HIDDEN].reshape(seq, N_HEADS, HEAD_DIM))
        k = pltpu.einshape(
            "shd->hsd", qkv[:, HIDDEN:2 * HIDDEN].reshape(seq, N_HEADS, HEAD_DIM))
        v = pltpu.einshape(
            "shd->hsd", qkv[:, 2 * HIDDEN:3 * HIDDEN].reshape(seq, N_HEADS, HEAD_DIM))

        # ---- batched multi-head attention (one softmax for all heads) ----
        # TODO(synk): no attention_mask is applied (inputs assumed unpadded)
        # and token_type_ids are 0, matching BertForQuestionAnswering defaults.
        scores = jnp.einsum("hsd,htd->hst", q, k,
                            preferred_element_type=jnp.float32)   # [H, S, S]
        scores = scores - jnp.max(scores, axis=-1, keepdims=True)
        p = jnp.exp(scores)
        p = p * pl.reciprocal(jnp.sum(p, axis=-1, keepdims=True), approx=True)
        ctx = jnp.einsum("hst,htd->hsd", p, v,
                         preferred_element_type=jnp.float32)      # [H, S, D]
        ctx = pltpu.einshape("hsd->shd", ctx).reshape(seq, HIDDEN)

        # ---- output projection + residual + layernorm ----
        attn_out = jnp.dot(ctx, wo_ref[l],
                           preferred_element_type=jnp.float32) + bo_ref[l]
        x = ln(attn_out + x, ln1_g_ref[l], ln1_b_ref[l])

        # ---- feed-forward + residual + layernorm ----
        hmid = _gelu(jnp.dot(x, w1_ref[l],
                             preferred_element_type=jnp.float32) + b1_ref[l])
        ffn_out = jnp.dot(hmid, w2_ref[l],
                          preferred_element_type=jnp.float32) + b2_ref[l]
        x = ln(ffn_out + x, ln2_g_ref[l], ln2_b_ref[l])

    # ---- QA head folded into the same kernel ----
    logits = jax.lax.dot_general(
        qa_wt_ref[...], x, (((1,), (1,)), ((), ())),
        preferred_element_type=jnp.float32) + qa_b_ref[...]       # [2, S]
    out_ref[0, :, :] = logits


# --------------------------- parameters (packed once) -----------------------

def init_params(key):
    """Random toy-BERT weights, packed ONCE into the kernel-ready layout."""
    def nrm(k, shape):
        return jax.random.normal(k, shape, jnp.float32) * 0.02

    keys = iter(jax.random.split(key, 8 + N_LAYERS * 8))
    scale = 1.0 / math.sqrt(HEAD_DIM)

    word_emb = nrm(next(keys), (VOCAB, HIDDEN))
    pos_emb = nrm(next(keys), (MAX_POS, HIDDEN))
    type_emb = nrm(next(keys), (2, HIDDEN))
    qa_w = nrm(next(keys), (HIDDEN, 2))

    wqkv, bqkv, wo, bo = [], [], [], []
    ln1_g, ln1_b, w1, b1, w2, b2, ln2_g, ln2_b = [], [], [], [], [], [], [], []
    for _ in range(N_LAYERS):
        wq = nrm(next(keys), (HIDDEN, HIDDEN)); bq = jnp.zeros((HIDDEN,), jnp.float32)
        wk = nrm(next(keys), (HIDDEN, HIDDEN)); bk = jnp.zeros((HIDDEN,), jnp.float32)
        wv = nrm(next(keys), (HIDDEN, HIDDEN)); bv = jnp.zeros((HIDDEN,), jnp.float32)
        # QKV fused along the output-lane axis; 1/sqrt(head_dim) folded into Q.
        wqkv.append(jnp.concatenate([wq * scale, wk, wv], axis=1))
        bqkv.append(jnp.concatenate([bq * scale, bk, bv])[None, :])
        wo.append(nrm(next(keys), (HIDDEN, HIDDEN)))
        bo.append(jnp.zeros((1, HIDDEN), jnp.float32))
        ln1_g.append(jnp.ones((1, HIDDEN), jnp.float32))
        ln1_b.append(jnp.zeros((1, HIDDEN), jnp.float32))
        w1.append(nrm(next(keys), (HIDDEN, INTER)))
        b1.append(jnp.zeros((1, INTER), jnp.float32))
        w2.append(nrm(next(keys), (INTER, HIDDEN)))
        b2.append(jnp.zeros((1, HIDDEN), jnp.float32))
        ln2_g.append(jnp.ones((1, HIDDEN), jnp.float32))
        ln2_b.append(jnp.zeros((1, HIDDEN), jnp.float32))

    return {
        "word_emb": word_emb,
        # token_type_ids default to 0 -> fold type_emb[0] into the positional rows.
        "pos_type": pos_emb + type_emb[0][None, :],
        "emb_g": jnp.ones((1, HIDDEN), jnp.float32),
        "emb_b": jnp.zeros((1, HIDDEN), jnp.float32),
        "wqkv": jnp.stack(wqkv), "bqkv": jnp.stack(bqkv),
        "wo": jnp.stack(wo), "bo": jnp.stack(bo),
        "ln1_g": jnp.stack(ln1_g), "ln1_b": jnp.stack(ln1_b),
        "w1": jnp.stack(w1), "b1": jnp.stack(b1),
        "w2": jnp.stack(w2), "b2": jnp.stack(b2),
        "ln2_g": jnp.stack(ln2_g), "ln2_b": jnp.stack(ln2_b),
        "qa_wt": qa_w.T,                       # [2, HIDDEN]
        "qa_b": jnp.zeros((2, 1), jnp.float32),
    }


# --------------------------- forward pass -----------------------------------

@jax.jit
def squad_model_forward(params, input_ids):
    """squad_model.forward(input) -> (start_logits, end_logits), each [B, S]."""
    B, S = input_ids.shape
    assert S <= MAX_POS, "sequence length exceeds position-embedding table"

    inputs = (params["word_emb"], params["pos_type"],
              params["emb_g"], params["emb_b"],
              params["wqkv"], params["bqkv"], params["wo"], params["bo"],
              params["ln1_g"], params["ln1_b"], params["w1"], params["b1"],
              params["w2"], params["b2"], params["ln2_g"], params["ln2_b"],
              params["qa_wt"], params["qa_b"])

    def full_spec(a):
        # Whole array resident in VMEM; constant block index across the grid.
        return pl.BlockSpec(a.shape, lambda b, ids, _nd=a.ndim: (0,) * _nd)

    out = pl.pallas_call(
        partial(_bert_fwd_kernel, seq=S),
        out_shape=jax.ShapeDtypeStruct((B, 2, S), jnp.float32),
        grid_spec=pltpu.PrefetchScalarGridSpec(
            num_scalar_prefetch=1,                 # input_ids -> SMEM
            grid=(B,),                             # batch on a parallel axis
            in_specs=[full_spec(a) for a in inputs],
            out_specs=pl.BlockSpec((1, 2, S), lambda b, ids: (b, 0, 0)),
            scratch_shapes=[pltpu.VMEM((S, HIDDEN), jnp.float32)],
        ),
        compiler_params=pltpu.CompilerParams(
            dimension_semantics=("parallel",)),    # uses both TCs on v7x
    )(input_ids, *inputs)

    start_logits = out[:, 0, :]
    end_logits = out[:, 1, :]
    return start_logits, end_logits


# TODO(synk): compute_metrics / get_metrics use `load_metric` (datasets/evaluate
# library) and have no Pallas equivalent; only the forward pass is implemented.

if __name__ == "__main__":
    key = jax.random.PRNGKey(0)
    pkey, dkey = jax.random.split(key)
    params = init_params(pkey)          # packing happens once, here

    B, S = 2, 8
    input_ids = jax.random.randint(dkey, (B, S), 0, VOCAB, dtype=jnp.int32)

    start_logits, end_logits = squad_model_forward(params, input_ids)
    jax.block_until_ready((start_logits, end_logits))

    assert start_logits.shape == (B, S) and end_logits.shape == (B, S)
    assert jnp.all(jnp.isfinite(start_logits)) and jnp.all(jnp.isfinite(end_logits))
    print("KERNEL_OK")
</pallas_src>

<mosaic_0001>
module attributes {stable_mosaic.version = 11 : i64} {
  func.func @_bert_fwd_kernel(%arg0: i32, %arg1: memref<2x8xi32, #tpu.memory_space<smem>>, %arg2: memref<64x32xf32, #tpu.memory_space<vmem>>, %arg3: memref<16x32xf32, #tpu.memory_space<vmem>>, %arg4: memref<1x32xf32, #tpu.memory_space<vmem>>, %arg5: memref<1x32xf32, #tpu.memory_space<vmem>>, %arg6: memref<2x32x96xf32, #tpu.memory_space<vmem>>, %arg7: memref<2x1x96xf32, #tpu.memory_space<vmem>>, %arg8: memref<2x32x32xf32, #tpu.memory_space<vmem>>, %arg9: memref<2x1x32xf32, #tpu.memory_space<vmem>>, %arg10: memref<2x1x32xf32, #tpu.memory_space<vmem>>, %arg11: memref<2x1x32xf32, #tpu.memory_space<vmem>>, %arg12: memref<2x32x64xf32, #tpu.memory_space<vmem>>, %arg13: memref<2x1x64xf32, #tpu.memory_space<vmem>>, %arg14: memref<2x64x32xf32, #tpu.memory_space<vmem>>, %arg15: memref<2x1x32xf32, #tpu.memory_space<vmem>>, %arg16: memref<2x1x32xf32, #tpu.memory_space<vmem>>, %arg17: memref<2x1x32xf32, #tpu.memory_space<vmem>>, %arg18: memref<2x32xf32, #tpu.memory_space<vmem>>, %arg19: memref<2x1xf32, #tpu.memory_space<vmem>>, %arg20: memref<1x2x8xf32, #tpu.memory_space<vmem>>, %arg21: memref<8x32xf32, #tpu.memory_space<vmem>>) attributes {dimension_semantics = [#tpu.dimension_semantics<parallel>], iteration_bounds = array<i64: 2>, scalar_prefetch = 1 : i64, scratch_operands = 1 : i64, tpu.core_type = #tpu.core_type<tc>, window_params = [{pipeline_mode = #tpu.pipeline_mode<synchronous>, transform_indices = @transform_0, window_bounds = array<i64: 64, 32>}, {pipeline_mode = #tpu.pipeline_mode<synchronous>, transform_indices = @transform_1, window_bounds = array<i64: 16, 32>}, {pipeline_mode = #tpu.pipeline_mode<synchronous>, transform_indices = @transform_2, window_bounds = array<i64: 1, 32>}, {pipeline_mode = #tpu.pipeline_mode<synchronous>, transform_indices = @transform_3, window_bounds = array<i64: 1, 32>}, {pipeline_mode = #tpu.pipeline_mode<synchronous>, transform_indices = @transform_4, window_bounds = array<i64: 2, 32, 96>}, {pipeline_mode = #tpu.pipeline_mode<synchronous>, transform_indices = @transform_5, window_bounds = array<i64: 2, 1, 96>}, {pipeline_mode = #tpu.pipeline_mode<synchronous>, transform_indices = @transform_6, window_bounds = array<i64: 2, 32, 32>}, {pipeline_mode = #tpu.pipeline_mode<synchronous>, transform_indices = @transform_7, window_bounds = array<i64: 2, 1, 32>}, {pipeline_mode = #tpu.pipeline_mode<synchronous>, transform_indices = @transform_8, window_bounds = array<i64: 2, 1, 32>}, {pipeline_mode = #tpu.pipeline_mode<synchronous>, transform_indices = @transform_9, window_bounds = array<i64: 2, 1, 32>}, {pipeline_mode = #tpu.pipeline_mode<synchronous>, transform_indices = @transform_10, window_bounds = array<i64: 2, 32, 64>}, {pipeline_mode = #tpu.pipeline_mode<synchronous>, transform_indices = @transform_11, window_bounds = array<i64: 2, 1, 64>}, {pipeline_mode = #tpu.pipeline_mode<synchronous>, transform_indices = @transform_12, window_bounds = array<i64: 2, 64, 32>}, {pipeline_mode = #tpu.pipeline_mode<synchronous>, transform_indices = @transform_13, window_bounds = array<i64: 2, 1, 32>}, {pipeline_mode = #tpu.pipeline_mode<synchronous>, transform_indices = @transform_14, window_bounds = array<i64: 2, 1, 32>}, {pipeline_mode = #tpu.pipeline_mode<synchronous>, transform_indices = @transform_15, window_bounds = array<i64: 2, 1, 32>}, {pipeline_mode = #tpu.pipeline_mode<synchronous>, transform_indices = @transform_16, window_bounds = array<i64: 2, 32>}, {pipeline_mode = #tpu.pipeline_mode<synchronous>, transform_indices = @transform_17, window_bounds = array<i64: 2, 1>}, {transform_indices = @transform_18, window_bounds = array<i64: 1, 2, 8>}]} {
    %0 = arith.index_cast %arg0 : i32 to index
    %c0 = arith.constant 0 : index
    %1 = memref.load %arg1[%0, %c0] : memref<2x8xi32, #tpu.memory_space<smem>>
    %2 = arith.index_cast %1 : i32 to index
    %c0_0 = arith.constant 0 : index
    %3 = vector.load %arg2[%2, %c0_0] : memref<64x32xf32, #tpu.memory_space<vmem>>, vector<1x32xf32>
    %c0_1 = arith.constant 0 : index
    %c0_2 = arith.constant 0 : index
    %4 = vector.load %arg21[%c0_1, %c0_2] : memref<8x32xf32, #tpu.memory_space<vmem>>, vector<1x32xf32>
    tpu.vector_store %arg21[%c0_1, %c0_2], %3 {strides = array<i32>} : memref<8x32xf32, #tpu.memory_space<vmem>>, vector<1x32xf32>,
    %5 = arith.index_cast %arg0 : i32 to index
    %c1 = arith.constant 1 : index
    %6 = memref.load %arg1[%5, %c1] : memref<2x8xi32, #tpu.memory_space<smem>>
    %7 = arith.index_cast %6 : i32 to index
    %c0_3 = arith.constant 0 : index
    %8 = vector.load %arg2[%7, %c0_3] : memref<64x32xf32, #tpu.memory_space<vmem>>, vector<1x32xf32>
    %c1_4 = arith.constant 1 : index
    %c0_5 = arith.constant 0 : index
    %9 = vector.load %arg21[%c1_4, %c0_5] : memref<8x32xf32, #tpu.memory_space<vmem>>, vector<1x32xf32>
    tpu.vector_store %arg21[%c1_4, %c0_5], %8 {strides = array<i32>} : memref<8x32xf32, #tpu.memory_space<vmem>>, vector<1x32xf32>,
    %10 = arith.index_cast %arg0 : i32 to index
    %c2 = arith.constant 2 : index
    %11 = memref.load %arg1[%10, %c2] : memref<2x8xi32, #tpu.memory_space<smem>>
    %12 = arith.index_cast %11 : i32 to index
    %c0_6 = arith.constant 0 : index
    %13 = vector.load %arg2[%12, %c0_6] : memref<64x32xf32, #tpu.memory_space<vmem>>, vector<1x32xf32>
    %c2_7 = arith.constant 2 : index
    %c0_8 = arith.constant 0 : index
    %14 = vector.load %arg21[%c2_7, %c0_8] : memref<8x32xf32, #tpu.memory_space<vmem>>, vector<1x32xf32>
    tpu.vector_store %arg21[%c2_7, %c0_8], %13 {strides = array<i32>} : memref<8x32xf32, #tpu.memory_space<vmem>>, vector<1x32xf32>,
    %15 = arith.index_cast %arg0 : i32 to index
    %c3 = arith.constant 3 : index
    %16 = memref.load %arg1[%15, %c3] : memref<2x8xi32, #tpu.memory_space<smem>>
    %17 = arith.index_cast %16 : i32 to index
    %c0_9 = arith.constant 0 : index
    %18 = vector.load %arg2[%17, %c0_9] : memref<64x32xf32, #tpu.memory_space<vmem>>, vector<1x32xf32>
    %c3_10 = arith.constant 3 : index
    %c0_11 = arith.constant 0 : index
    %19 = vector.load %arg21[%c3_10, %c0_11] : memref<8x32xf32, #tpu.memory_space<vmem>>, vector<1x32xf32>
    tpu.vector_store %arg21[%c3_10, %c0_11], %18 {strides = array<i32>} : memref<8x32xf32, #tpu.memory_space<vmem>>, vector<1x32xf32>,
    %20 = arith.index_cast %arg0 : i32 to index
    %c4 = arith.constant 4 : index
    %21 = memref.load %arg1[%20, %c4] : memref<2x8xi32, #tpu.memory_space<smem>>
    %22 = arith.index_cast %21 : i32 to index
    %c0_12 = arith.constant 0 : index
    %23 = vector.load %arg2[%22, %c0_12] : memref<64x32xf32, #tpu.memory_space<vmem>>, vector<1x32xf32>
    %c4_13 = arith.constant 4 : index
    %c0_14 = arith.constant 0 : index
    %24 = vector.load %arg21[%c4_13, %c0_14] : memref<8x32xf32, #tpu.memory_space<vmem>>, vector<1x32xf32>
    tpu.vector_store %arg21[%c4_13, %c0_14], %23 {strides = array<i32>} : memref<8x32xf32, #tpu.memory_space<vmem>>, vector<1x32xf32>,
    %25 = arith.index_cast %arg0 : i32 to index
    %c5 = arith.constant 5 : index
    %26 = memref.load %arg1[%25, %c5] : memref<2x8xi32, #tpu.memory_space<smem>>
    %27 = arith.index_cast %26 : i32 to index
    %c0_15 = arith.constant 0 : index
    %28 = vector.load %arg2[%27, %c0_15] : memref<64x32xf32, #tpu.memory_space<vmem>>, vector<1x32xf32>
    %c5_16 = arith.constant 5 : index
    %c0_17 = arith.constant 0 : index
    %29 = vector.load %arg21[%c5_16, %c0_17] : memref<8x32xf32, #tpu.memory_space<vmem>>, vector<1x32xf32>
    tpu.vector_store %arg21[%c5_16, %c0_17], %28 {strides = array<i32>} : memref<8x32xf32, #tpu.memory_space<vmem>>, vector<1x32xf32>,
    %30 = arith.index_cast %arg0 : i32 to index
    %c6 = arith.constant 6 : index
    %31 = memref.load %arg1[%30, %c6] : memref<2x8xi32, #tpu.memory_space<smem>>
    %32 = arith.index_cast %31 : i32 to index
    %c0_18 = arith.constant 0 : index
    %33 = vector.load %arg2[%32, %c0_18] : memref<64x32xf32, #tpu.memory_space<vmem>>, vector<1x32xf32>
    %c6_19 = arith.constant 6 : index
    %c0_20 = arith.constant 0 : index
    %34 = vector.load %arg21[%c6_19, %c0_20] : memref<8x32xf32, #tpu.memory_space<vmem>>, vector<1x32xf32>
    tpu.vector_store %arg21[%c6_19, %c0_20], %33 {strides = array<i32>} : memref<8x32xf32, #tpu.memory_space<vmem>>, vector<1x32xf32>,
    %35 = arith.index_cast %arg0 : i32 to index
    %c7 = arith.constant 7 : index
    %36 = memref.load %arg1[%35, %c7] : memref<2x8xi32, #tpu.memory_space<smem>>
    %37 = arith.index_cast %36 : i32 to index
    %c0_21 = arith.constant 0 : index
    %38 = vector.load %arg2[%37, %c0_21] : memref<64x32xf32, #tpu.memory_space<vmem>>, vector<1x32xf32>
    %c7_22 = arith.constant 7 : index
    %c0_23 = arith.constant 0 : index
    %39 = vector.load %arg21[%c7_22, %c0_23] : memref<8x32xf32, #tpu.memory_space<vmem>>, vector<1x32xf32>
    tpu.vector_store %arg21[%c7_22, %c0_23], %38 {strides = array<i32>} : memref<8x32xf32, #tpu.memory_space<vmem>>, vector<1x32xf32>,
    %c0_24 = arith.constant 0 : index
    %c0_25 = arith.constant 0 : index
    %40 = vector.load %arg21[%c0_24, %c0_25] : memref<8x32xf32, #tpu.memory_space<vmem>>, vector<8x32xf32>
    %c0_26 = arith.constant 0 : index
    %c0_27 = arith.constant 0 : index
    %41 = vector.load %arg3[%c0_26, %c0_27] : memref<16x32xf32, #tpu.memory_space<vmem>>, vector<8x32xf32>
    %42 = arith.addf %40, %41 : vector<8x32xf32>
    %c0_28 = arith.constant 0 : index
    %c0_29 = arith.constant 0 : index
    %43 = vector.load %arg4[%c0_28, %c0_29] : memref<1x32xf32, #tpu.memory_space<vmem>>, vector<1x32xf32>
    %c0_30 = arith.constant 0 : index
    %c0_31 = arith.constant 0 : index
    %44 = vector.load %arg5[%c0_30, %c0_31] : memref<1x32xf32, #tpu.memory_space<vmem>>, vector<1x32xf32>
    %cst = arith.constant dense<0.000000e+00> : vector<8xf32>
    %45 = vector.multi_reduction <add>, %42, %cst [1] : vector<8x32xf32> to vector<8xf32>
    %46 = vector.shape_cast %45 : vector<8xf32> to vector<8x1xf32>
    %cst_32 = arith.constant 3.200000e+01 : f32
    %47 = vector.broadcast %cst_32 : f32 to vector<8x1xf32>
    %48 = arith.divf %46, %47 : vector<8x1xf32>
    %49 = vector.broadcast %48 : vector<8x1xf32> to vector<8x32xf32>
    %50 = arith.subf %42, %49 : vector<8x32xf32>
    %51 = arith.mulf %50, %50 : vector<8x32xf32>
    %cst_33 = arith.constant dense<0.000000e+00> : vector<8xf32>
    %52 = vector.multi_reduction <add>, %51, %cst_33 [1] : vector<8x32xf32> to vector<8xf32>
    %53 = vector.shape_cast %52 : vector<8xf32> to vector<8x1xf32>
    %cst_34 = arith.constant 3.200000e+01 : f32
    %54 = vector.broadcast %cst_34 : f32 to vector<8x1xf32>
    %55 = arith.divf %53, %54 : vector<8x1xf32>
    %cst_35 = arith.constant 9.99999996E-13 : f32
    %56 = vector.broadcast %cst_35 : f32 to vector<8x1xf32>
    %57 = arith.addf %55, %56 : vector<8x1xf32>
    %58 = math.rsqrt %57 : vector<8x1xf32>
    %59 = vector.broadcast %58 : vector<8x1xf32> to vector<8x32xf32>
    %60 = arith.mulf %50, %59 : vector<8x32xf32>
    %61 = vector.broadcast %43 : vector<1x32xf32> to vector<8x32xf32>
    %62 = arith.mulf %60, %61 : vector<8x32xf32>
    %63 = vector.broadcast %44 : vector<1x32xf32> to vector<8x32xf32>
    %64 = arith.addf %62, %63 : vector<8x32xf32>
    %c0_36 = arith.constant 0 : index
    %c0_37 = arith.constant 0 : index
    %c0_38 = arith.constant 0 : index
    %65 = vector.load %arg6[%c0_36, %c0_37, %c0_38] : memref<2x32x96xf32, #tpu.memory_space<vmem>>, vector<1x32x96xf32>
    %66 = vector.shape_cast %65 : vector<1x32x96xf32> to vector<32x96xf32>
    %cst_39 = arith.constant dense<0.000000e+00> : vector<8x96xf32>
    %67 = tpu.matmul %64, %66, %cst_39 {dimension_numbers = #tpu.dot_dimension_numbers<[1], [0], [0], [1], [0, 0, 1, 1], [], []>} : vector<8x32xf32>, vector<32x96xf32>, vector<8x96xf32> -> vector<8x96xf32>
    %c0_40 = arith.constant 0 : index
    %c0_41 = arith.constant 0 : index
    %c0_42 = arith.constant 0 : index
    %68 = vector.load %arg7[%c0_40, %c0_41, %c0_42] : memref<2x1x96xf32, #tpu.memory_space<vmem>>, vector<1x1x96xf32>
    %69 = vector.shape_cast %68 : vector<1x1x96xf32> to vector<1x96xf32>
    %70 = vector.broadcast %69 : vector<1x96xf32> to vector<8x96xf32>
    %71 = arith.addf %67, %70 : vector<8x96xf32>
    %72 = vector.extract_strided_slice %71 {offsets = [0, 0], sizes = [8, 32], strides = [1, 1]} : vector<8x96xf32> to vector<8x32xf32>
    %73 = vector.shape_cast %72 : vector<8x32xf32> to vector<8x4x8xf32>
    %74 = tpu.transpose %73, [1, 0, 2] : vector<8x4x8xf32> -> vector<4x8x8xf32>
    %75 = vector.extract_strided_slice %71 {offsets = [0, 32], sizes = [8, 32], strides = [1, 1]} : vector<8x96xf32> to vector<8x32xf32>
    %76 = vector.shape_cast %75 : vector<8x32xf32> to vector<8x4x8xf32>
    %77 = tpu.transpose %76, [1, 0, 2] : vector<8x4x8xf32> -> vector<4x8x8xf32>
    %78 = vector.extract_strided_slice %71 {offsets = [0, 64], sizes = [8, 32], strides = [1, 1]} : vector<8x96xf32> to vector<8x32xf32>
    %79 = vector.shape_cast %78 : vector<8x32xf32> to vector<8x4x8xf32>
    %80 = tpu.transpose %79, [1, 0, 2] : vector<8x4x8xf32> -> vector<4x8x8xf32>
    "tpu.trace_start"() <{level = 10 : i32, message = "hsd,htd->hst"}> : () -> ()
    %cst_43 = arith.constant dense<0.000000e+00> : vector<4x8x8xf32>
    %81 = tpu.matmul %74, %77, %cst_43 {dimension_numbers = #tpu.dot_dimension_numbers<[2], [2], [1], [1], [0, 0, 0, 1, 1, 1], [0], [0]>} : vector<4x8x8xf32>, vector<4x8x8xf32>, vector<4x8x8xf32> -> vector<4x8x8xf32>
    "tpu.trace_stop"() : () -> ()
    %cst_44 = arith.constant dense<0xFF800000> : vector<4x8xf32>
    %82 = vector.multi_reduction <maximumf>, %81, %cst_44 [2] : vector<4x8x8xf32> to vector<4x8xf32>
    %83 = vector.shape_cast %82 : vector<4x8xf32> to vector<4x8x1xf32>
    %84 = vector.broadcast %83 : vector<4x8x1xf32> to vector<4x8x8xf32>
    %85 = arith.subf %81, %84 : vector<4x8x8xf32>
    %86 = math.exp %85 : vector<4x8x8xf32>
    %cst_45 = arith.constant dense<0.000000e+00> : vector<4x8xf32>
    %87 = vector.multi_reduction <add>, %86, %cst_45 [2] : vector<4x8x8xf32> to vector<4x8xf32>
    %88 = vector.shape_cast %87 : vector<4x8xf32> to vector<4x8x1xf32>
    %89 = tpu.reciprocal %88 {approx = true} : vector<4x8x1xf32> -> vector<4x8x1xf32>
    %90 = vector.broadcast %89 : vector<4x8x1xf32> to vector<4x8x8xf32>
    %91 = arith.mulf %86, %90 : vector<4x8x8xf32>
    "tpu.trace_start"() <{level = 10 : i32, message = "hst,htd->hsd"}> : () -> ()
    %cst_46 = arith.constant dense<0.000000e+00> : vector<4x8x8xf32>
    %92 = tpu.matmul %91, %80, %cst_46 {dimension_numbers = #tpu.dot_dimension_numbers<[2], [1], [1], [2], [0, 0, 0, 1, 1, 2], [0], [0]>} : vector<4x8x8xf32>, vector<4x8x8xf32>, vector<4x8x8xf32> -> vector<4x8x8xf32>
    "tpu.trace_stop"() : () -> ()
    %93 = tpu.transpose %92, [1, 0, 2] : vector<4x8x8xf32> -> vector<8x4x8xf32>
    %94 = vector.shape_cast %93 : vector<8x4x8xf32> to vector<8x32xf32>
    %c0_47 = arith.constant 0 : index
    %c0_48 = arith.constant 0 : index
    %c0_49 = arith.constant 0 : index
    %95 = vector.load %arg8[%c0_47, %c0_48, %c0_49] : memref<2x32x32xf32, #tpu.memory_space<vmem>>, vector<1x32x32xf32>
    %96 = vector.shape_cast %95 : vector<1x32x32xf32> to vector<32x32xf32>
    %cst_50 = arith.constant dense<0.000000e+00> : vector<8x32xf32>
    %97 = tpu.matmul %94, %96, %cst_50 {dimension_numbers = #tpu.dot_dimension_numbers<[1], [0], [0], [1], [0, 0, 1, 1], [], []>} : vector<8x32xf32>, vector<32x32xf32>, vector<8x32xf32> -> vector<8x32xf32>
    %c0_51 = arith.constant 0 : index
    %c0_52 = arith.constant 0 : index
    %c0_53 = arith.constant 0 : index
    %98 = vector.load %arg9[%c0_51, %c0_52, %c0_53] : memref<2x1x32xf32, #tpu.memory_space<vmem>>, vector<1x1x32xf32>
    %99 = vector.shape_cast %98 : vector<1x1x32xf32> to vector<1x32xf32>
    %100 = vector.broadcast %99 : vector<1x32xf32> to vector<8x32xf32>
    %101 = arith.addf %97, %100 : vector<8x32xf32>
    %102 = arith.addf %101, %64 : vector<8x32xf32>
    %c0_54 = arith.constant 0 : index
    %c0_55 = arith.constant 0 : index
    %c0_56 = arith.constant 0 : index
    %103 = vector.load %arg10[%c0_54, %c0_55, %c0_56] : memref<2x1x32xf32, #tpu.memory_space<vmem>>, vector<1x1x32xf32>
    %104 = vector.shape_cast %103 : vector<1x1x32xf32> to vector<1x32xf32>
    %c0_57 = arith.constant 0 : index
    %c0_58 = arith.constant 0 : index
    %c0_59 = arith.constant 0 : index
    %105 = vector.load %arg11[%c0_57, %c0_58, %c0_59] : memref<2x1x32xf32, #tpu.memory_space<vmem>>, vector<1x1x32xf32>
    %106 = vector.shape_cast %105 : vector<1x1x32xf32> to vector<1x32xf32>
    %cst_60 = arith.constant dense<0.000000e+00> : vector<8xf32>
    %107 = vector.multi_reduction <add>, %102, %cst_60 [1] : vector<8x32xf32> to vector<8xf32>
    %108 = vector.shape_cast %107 : vector<8xf32> to vector<8x1xf32>
    %cst_61 = arith.constant 3.200000e+01 : f32
    %109 = vector.broadcast %cst_61 : f32 to vector<8x1xf32>
    %110 = arith.divf %108, %109 : vector<8x1xf32>
    %111 = vector.broadcast %110 : vector<8x1xf32> to vector<8x32xf32>
    %112 = arith.subf %102, %111 : vector<8x32xf32>
    %113 = arith.mulf %112, %112 : vector<8x32xf32>
    %cst_62 = arith.constant dense<0.000000e+00> : vector<8xf32>
    %114 = vector.multi_reduction <add>, %113, %cst_62 [1] : vector<8x32xf32> to vector<8xf32>
    %115 = vector.shape_cast %114 : vector<8xf32> to vector<8x1xf32>
    %cst_63 = arith.constant 3.200000e+01 : f32
    %116 = vector.broadcast %cst_63 : f32 to vector<8x1xf32>
    %117 = arith.divf %115, %116 : vector<8x1xf32>
    %cst_64 = arith.constant 9.99999996E-13 : f32
    %118 = vector.broadcast %cst_64 : f32 to vector<8x1xf32>
    %119 = arith.addf %117, %118 : vector<8x1xf32>
    %120 = math.rsqrt %119 : vector<8x1xf32>
    %121 = vector.broadcast %120 : vector<8x1xf32> to vector<8x32xf32>
    %122 = arith.mulf %112, %121 : vector<8x32xf32>
    %123 = vector.broadcast %104 : vector<1x32xf32> to vector<8x32xf32>
    %124 = arith.mulf %122, %123 : vector<8x32xf32>
    %125 = vector.broadcast %106 : vector<1x32xf32> to vector<8x32xf32>
    %126 = arith.addf %124, %125 : vector<8x32xf32>
    %c0_65 = arith.constant 0 : index
    %c0_66 = arith.constant 0 : index
    %c0_67 = arith.constant 0 : index
    %127 = vector.load %arg12[%c0_65, %c0_66, %c0_67] : memref<2x32x64xf32, #tpu.memory_space<vmem>>, vector<1x32x64xf32>
    %128 = vector.shape_cast %127 : vector<1x32x64xf32> to vector<32x64xf32>
    %cst_68 = arith.constant dense<0.000000e+00> : vector<8x64xf32>
    %129 = tpu.matmul %126, %128, %cst_68 {dimension_numbers = #tpu.dot_dimension_numbers<[1], [0], [0], [1], [0, 0, 1, 1], [], []>} : vector<8x32xf32>, vector<32x64xf32>, vector<8x64xf32> -> vector<8x64xf32>
    %c0_69 = arith.constant 0 : index
    %c0_70 = arith.constant 0 : index
    %c0_71 = arith.constant 0 : index
    %130 = vector.load %arg13[%c0_69, %c0_70, %c0_71] : memref<2x1x64xf32, #tpu.memory_space<vmem>>, vector<1x1x64xf32>
    %131 = vector.shape_cast %130 : vector<1x1x64xf32> to vector<1x64xf32>
    %132 = vector.broadcast %131 : vector<1x64xf32> to vector<8x64xf32>
    %133 = arith.addf %129, %132 : vector<8x64xf32>
    %cst_72 = arith.constant 5.000000e-01 : f32
    %134 = vector.broadcast %cst_72 : f32 to vector<8x64xf32>
    %135 = arith.mulf %134, %133 : vector<8x64xf32>
    %cst_73 = arith.constant 4.471500e-02 : f32
    %136 = vector.broadcast %cst_73 : f32 to vector<8x64xf32>
    %137 = arith.mulf %136, %133 : vector<8x64xf32>
    %138 = arith.mulf %137, %133 : vector<8x64xf32>
    %139 = arith.mulf %138, %133 : vector<8x64xf32>
    %140 = arith.addf %133, %139 : vector<8x64xf32>
    %cst_74 = arith.constant 0.797884583 : f32
    %141 = vector.broadcast %cst_74 : f32 to vector<8x64xf32>
    %142 = arith.mulf %141, %140 : vector<8x64xf32>
    %143 = math.tanh %142 : vector<8x64xf32>
    %cst_75 = arith.constant 1.000000e+00 : f32
    %144 = vector.broadcast %cst_75 : f32 to vector<8x64xf32>
    %145 = arith.addf %144, %143 : vector<8x64xf32>
    %146 = arith.mulf %135, %145 : vector<8x64xf32>
    %c0_76 = arith.constant 0 : index
    %c0_77 = arith.constant 0 : index
    %c0_78 = arith.constant 0 : index
    %147 = vector.load %arg14[%c0_76, %c0_77, %c0_78] : memref<2x64x32xf32, #tpu.memory_space<vmem>>, vector<1x64x32xf32>
    %148 = vector.shape_cast %147 : vector<1x64x32xf32> to vector<64x32xf32>
    %cst_79 = arith.constant dense<0.000000e+00> : vector<8x32xf32>
    %149 = tpu.matmul %146, %148, %cst_79 {dimension_numbers = #tpu.dot_dimension_numbers<[1], [0], [0], [1], [0, 0, 1, 1], [], []>} : vector<8x64xf32>, vector<64x32xf32>, vector<8x32xf32> -> vector<8x32xf32>
    %c0_80 = arith.constant 0 : index
    %c0_81 = arith.constant 0 : index
    %c0_82 = arith.constant 0 : index
    %150 = vector.load %arg15[%c0_80, %c0_81, %c0_82] : memref<2x1x32xf32, #tpu.memory_space<vmem>>, vector<1x1x32xf32>
    %151 = vector.shape_cast %150 : vector<1x1x32xf32> to vector<1x32xf32>
    %152 = vector.broadcast %151 : vector<1x32xf32> to vector<8x32xf32>
    %153 = arith.addf %149, %152 : vector<8x32xf32>
    %154 = arith.addf %153, %126 : vector<8x32xf32>
    %c0_83 = arith.constant 0 : index
    %c0_84 = arith.constant 0 : index
    %c0_85 = arith.constant 0 : index
    %155 = vector.load %arg16[%c0_83, %c0_84, %c0_85] : memref<2x1x32xf32, #tpu.memory_space<vmem>>, vector<1x1x32xf32>
    %156 = vector.shape_cast %155 : vector<1x1x32xf32> to vector<1x32xf32>
    %c0_86 = arith.constant 0 : index
    %c0_87 = arith.constant 0 : index
    %c0_88 = arith.constant 0 : index
    %157 = vector.load %arg17[%c0_86, %c0_87, %c0_88] : memref<2x1x32xf32, #tpu.memory_space<vmem>>, vector<1x1x32xf32>
    %158 = vector.shape_cast %157 : vector<1x1x32xf32> to vector<1x32xf32>
    %cst_89 = arith.constant dense<0.000000e+00> : vector<8xf32>
    %159 = vector.multi_reduction <add>, %154, %cst_89 [1] : vector<8x32xf32> to vector<8xf32>
    %160 = vector.shape_cast %159 : vector<8xf32> to vector<8x1xf32>
    %cst_90 = arith.constant 3.200000e+01 : f32
    %161 = vector.broadcast %cst_90 : f32 to vector<8x1xf32>
    %162 = arith.divf %160, %161 : vector<8x1xf32>
    %163 = vector.broadcast %162 : vector<8x1xf32> to vector<8x32xf32>
    %164 = arith.subf %154, %163 : vector<8x32xf32>
    %165 = arith.mulf %164, %164 : vector<8x32xf32>
    %cst_91 = arith.constant dense<0.000000e+00> : vector<8xf32>
    %166 = vector.multi_reduction <add>, %165, %cst_91 [1] : vector<8x32xf32> to vector<8xf32>
    %167 = vector.shape_cast %166 : vector<8xf32> to vector<8x1xf32>
    %cst_92 = arith.constant 3.200000e+01 : f32
    %168 = vector.broadcast %cst_92 : f32 to vector<8x1xf32>
    %169 = arith.divf %167, %168 : vector<8x1xf32>
    %cst_93 = arith.constant 9.99999996E-13 : f32
    %170 = vector.broadcast %cst_93 : f32 to vector<8x1xf32>
    %171 = arith.addf %169, %170 : vector<8x1xf32>
    %172 = math.rsqrt %171 : vector<8x1xf32>
    %173 = vector.broadcast %172 : vector<8x1xf32> to vector<8x32xf32>
    %174 = arith.mulf %164, %173 : vector<8x32xf32>
    %175 = vector.broadcast %156 : vector<1x32xf32> to vector<8x32xf32>
    %176 = arith.mulf %174, %175 : vector<8x32xf32>
    %177 = vector.broadcast %158 : vector<1x32xf32> to vector<8x32xf32>
    %178 = arith.addf %176, %177 : vector<8x32xf32>
    %c1_94 = arith.constant 1 : index
    %c0_95 = arith.constant 0 : index
    %c0_96 = arith.constant 0 : index
    %179 = vector.load %arg6[%c1_94, %c0_95, %c0_96] : memref<2x32x96xf32, #tpu.memory_space<vmem>>, vector<1x32x96xf32>
    %180 = vector.shape_cast %179 : vector<1x32x96xf32> to vector<32x96xf32>
    %cst_97 = arith.constant dense<0.000000e+00> : vector<8x96xf32>
    %181 = tpu.matmul %178, %180, %cst_97 {dimension_numbers = #tpu.dot_dimension_numbers<[1], [0], [0], [1], [0, 0, 1, 1], [], []>} : vector<8x32xf32>, vector<32x96xf32>, vector<8x96xf32> -> vector<8x96xf32>
    %c1_98 = arith.constant 1 : index
    %c0_99 = arith.constant 0 : index
    %c0_100 = arith.constant 0 : index
    %182 = vector.load %arg7[%c1_98, %c0_99, %c0_100] : memref<2x1x96xf32, #tpu.memory_space<vmem>>, vector<1x1x96xf32>
    %183 = vector.shape_cast %182 : vector<1x1x96xf32> to vector<1x96xf32>
    %184 = vector.broadcast %183 : vector<1x96xf32> to vector<8x96xf32>
    %185 = arith.addf %181, %184 : vector<8x96xf32>
    %186 = vector.extract_strided_slice %185 {offsets = [0, 0], sizes = [8, 32], strides = [1, 1]} : vector<8x96xf32> to vector<8x32xf32>
    %187 = vector.shape_cast %186 : vector<8x32xf32> to vector<8x4x8xf32>
    %188 = tpu.transpose %187, [1, 0, 2] : vector<8x4x8xf32> -> vector<4x8x8xf32>
    %189 = vector.extract_strided_slice %185 {offsets = [0, 32], sizes = [8, 32], strides = [1, 1]} : vector<8x96xf32> to vector<8x32xf32>
    %190 = vector.shape_cast %189 : vector<8x32xf32> to vector<8x4x8xf32>
    %191 = tpu.transpose %190, [1, 0, 2] : vector<8x4x8xf32> -> vector<4x8x8xf32>
    %192 = vector.extract_strided_slice %185 {offsets = [0, 64], sizes = [8, 32], strides = [1, 1]} : vector<8x96xf32> to vector<8x32xf32>
    %193 = vector.shape_cast %192 : vector<8x32xf32> to vector<8x4x8xf32>
    %194 = tpu.transpose %193, [1, 0, 2] : vector<8x4x8xf32> -> vector<4x8x8xf32>
    "tpu.trace_start"() <{level = 10 : i32, message = "hsd,htd->hst"}> : () -> ()
    %cst_101 = arith.constant dense<0.000000e+00> : vector<4x8x8xf32>
    %195 = tpu.matmul %188, %191, %cst_101 {dimension_numbers = #tpu.dot_dimension_numbers<[2], [2], [1], [1], [0, 0, 0, 1, 1, 1], [0], [0]>} : vector<4x8x8xf32>, vector<4x8x8xf32>, vector<4x8x8xf32> -> vector<4x8x8xf32>
    "tpu.trace_stop"() : () -> ()
    %cst_102 = arith.constant dense<0xFF800000> : vector<4x8xf32>
    %196 = vector.multi_reduction <maximumf>, %195, %cst_102 [2] : vector<4x8x8xf32> to vector<4x8xf32>
    %197 = vector.shape_cast %196 : vector<4x8xf32> to vector<4x8x1xf32>
    %198 = vector.broadcast %197 : vector<4x8x1xf32> to vector<4x8x8xf32>
    %199 = arith.subf %195, %198 : vector<4x8x8xf32>
    %200 = math.exp %199 : vector<4x8x8xf32>
    %cst_103 = arith.constant dense<0.000000e+00> : vector<4x8xf32>
    %201 = vector.multi_reduction <add>, %200, %cst_103 [2] : vector<4x8x8xf32> to vector<4x8xf32>
    %202 = vector.shape_cast %201 : vector<4x8xf32> to vector<4x8x1xf32>
    %203 = tpu.reciprocal %202 {approx = true} : vector<4x8x1xf32> -> vector<4x8x1xf32>
    %204 = vector.broadcast %203 : vector<4x8x1xf32> to vector<4x8x8xf32>
    %205 = arith.mulf %200, %204 : vector<4x8x8xf32>
    "tpu.trace_start"() <{level = 10 : i32, message = "hst,htd->hsd"}> : () -> ()
    %cst_104 = arith.constant dense<0.000000e+00> : vector<4x8x8xf32>
    %206 = tpu.matmul %205, %194, %cst_104 {dimension_numbers = #tpu.dot_dimension_numbers<[2], [1], [1], [2], [0, 0, 0, 1, 1, 2], [0], [0]>} : vector<4x8x8xf32>, vector<4x8x8xf32>, vector<4x8x8xf32> -> vector<4x8x8xf32>
    "tpu.trace_stop"() : () -> ()
    %207 = tpu.transpose %206, [1, 0, 2] : vector<4x8x8xf32> -> vector<8x4x8xf32>
    %208 = vector.shape_cast %207 : vector<8x4x8xf32> to vector<8x32xf32>
    %c1_105 = arith.constant 1 : index
    %c0_106 = arith.constant 0 : index
    %c0_107 = arith.constant 0 : index
    %209 = vector.load %arg8[%c1_105, %c0_106, %c0_107] : memref<2x32x32xf32, #tpu.memory_space<vmem>>, vector<1x32x32xf32>
    %210 = vector.shape_cast %209 : vector<1x32x32xf32> to vector<32x32xf32>
    %cst_108 = arith.constant dense<0.000000e+00> : vector<8x32xf32>
    %211 = tpu.matmul %208, %210, %cst_108 {dimension_numbers = #tpu.dot_dimension_numbers<[1], [0], [0], [1], [0, 0, 1, 1], [], []>} : vector<8x32xf32>, vector<32x32xf32>, vector<8x32xf32> -> vector<8x32xf32>
    %c1_109 = arith.constant 1 : index
    %c0_110 = arith.constant 0 : index
    %c0_111 = arith.constant 0 : index
    %212 = vector.load %arg9[%c1_109, %c0_110, %c0_111] : memref<2x1x32xf32, #tpu.memory_space<vmem>>, vector<1x1x32xf32>
    %213 = vector.shape_cast %212 : vector<1x1x32xf32> to vector<1x32xf32>
    %214 = vector.broadcast %213 : vector<1x32xf32> to vector<8x32xf32>
    %215 = arith.addf %211, %214 : vector<8x32xf32>
    %216 = arith.addf %215, %178 : vector<8x32xf32>
    %c1_112 = arith.constant 1 : index
    %c0_113 = arith.constant 0 : index
    %c0_114 = arith.constant 0 : index
    %217 = vector.load %arg10[%c1_112, %c0_113, %c0_114] : memref<2x1x32xf32, #tpu.memory_space<vmem>>, vector<1x1x32xf32>
    %218 = vector.shape_cast %217 : vector<1x1x32xf32> to vector<1x32xf32>
    %c1_115 = arith.constant 1 : index
    %c0_116 = arith.constant 0 : index
    %c0_117 = arith.constant 0 : index
    %219 = vector.load %arg11[%c1_115, %c0_116, %c0_117] : memref<2x1x32xf32, #tpu.memory_space<vmem>>, vector<1x1x32xf32>
    %220 = vector.shape_cast %219 : vector<1x1x32xf32> to vector<1x32xf32>
    %cst_118 = arith.constant dense<0.000000e+00> : vector<8xf32>
    %221 = vector.multi_reduction <add>, %216, %cst_118 [1] : vector<8x32xf32> to vector<8xf32>
    %222 = vector.shape_cast %221 : vector<8xf32> to vector<8x1xf32>
    %cst_119 = arith.constant 3.200000e+01 : f32
    %223 = vector.broadcast %cst_119 : f32 to vector<8x1xf32>
    %224 = arith.divf %222, %223 : vector<8x1xf32>
    %225 = vector.broadcast %224 : vector<8x1xf32> to vector<8x32xf32>
    %226 = arith.subf %216, %225 : vector<8x32xf32>
    %227 = arith.mulf %226, %226 : vector<8x32xf32>
    %cst_120 = arith.constant dense<0.000000e+00> : vector<8xf32>
    %228 = vector.multi_reduction <add>, %227, %cst_120 [1] : vector<8x32xf32> to vector<8xf32>
    %229 = vector.shape_cast %228 : vector<8xf32> to vector<8x1xf32>
    %cst_121 = arith.constant 3.200000e+01 : f32
    %230 = vector.broadcast %cst_121 : f32 to vector<8x1xf32>
    %231 = arith.divf %229, %230 : vector<8x1xf32>
    %cst_122 = arith.constant 9.99999996E-13 : f32
    %232 = vector.broadcast %cst_122 : f32 to vector<8x1xf32>
    %233 = arith.addf %231, %232 : vector<8x1xf32>
    %234 = math.rsqrt %233 : vector<8x1xf32>
    %235 = vector.broadcast %234 : vector<8x1xf32> to vector<8x32xf32>
    %236 = arith.mulf %226, %235 : vector<8x32xf32>
    %237 = vector.broadcast %218 : vector<1x32xf32> to vector<8x32xf32>
    %238 = arith.mulf %236, %237 : vector<8x32xf32>
    %239 = vector.broadcast %220 : vector<1x32xf32> to vector<8x32xf32>
    %240 = arith.addf %238, %239 : vector<8x32xf32>
    %c1_123 = arith.constant 1 : index
    %c0_124 = arith.constant 0 : index
    %c0_125 = arith.constant 0 : index
    %241 = vector.load %arg12[%c1_123, %c0_124, %c0_125] : memref<2x32x64xf32, #tpu.memory_space<vmem>>, vector<1x32x64xf32>
    %242 = vector.shape_cast %241 : vector<1x32x64xf32> to vector<32x64xf32>
    %cst_126 = arith.constant dense<0.000000e+00> : vector<8x64xf32>
    %243 = tpu.matmul %240, %242, %cst_126 {dimension_numbers = #tpu.dot_dimension_numbers<[1], [0], [0], [1], [0, 0, 1, 1], [], []>} : vector<8x32xf32>, vector<32x64xf32>, vector<8x64xf32> -> vector<8x64xf32>
    %c1_127 = arith.constant 1 : index
    %c0_128 = arith.constant 0 : index
    %c0_129 = arith.constant 0 : index
    %244 = vector.load %arg13[%c1_127, %c0_128, %c0_129] : memref<2x1x64xf32, #tpu.memory_space<vmem>>, vector<1x1x64xf32>
    %245 = vector.shape_cast %244 : vector<1x1x64xf32> to vector<1x64xf32>
    %246 = vector.broadcast %245 : vector<1x64xf32> to vector<8x64xf32>
    %247 = arith.addf %243, %246 : vector<8x64xf32>
    %cst_130 = arith.constant 5.000000e-01 : f32
    %248 = vector.broadcast %cst_130 : f32 to vector<8x64xf32>
    %249 = arith.mulf %248, %247 : vector<8x64xf32>
    %cst_131 = arith.constant 4.471500e-02 : f32
    %250 = vector.broadcast %cst_131 : f32 to vector<8x64xf32>
    %251 = arith.mulf %250, %247 : vector<8x64xf32>
    %252 = arith.mulf %251, %247 : vector<8x64xf32>
    %253 = arith.mulf %252, %247 : vector<8x64xf32>
    %254 = arith.addf %247, %253 : vector<8x64xf32>
    %cst_132 = arith.constant 0.797884583 : f32
    %255 = vector.broadcast %cst_132 : f32 to vector<8x64xf32>
    %256 = arith.mulf %255, %254 : vector<8x64xf32>
    %257 = math.tanh %256 : vector<8x64xf32>
    %cst_133 = arith.constant 1.000000e+00 : f32
    %258 = vector.broadcast %cst_133 : f32 to vector<8x64xf32>
    %259 = arith.addf %258, %257 : vector<8x64xf32>
    %260 = arith.mulf %249, %259 : vector<8x64xf32>
    %c1_134 = arith.constant 1 : index
    %c0_135 = arith.constant 0 : index
    %c0_136 = arith.constant 0 : index
    %261 = vector.load %arg14[%c1_134, %c0_135, %c0_136] : memref<2x64x32xf32, #tpu.memory_space<vmem>>, vector<1x64x32xf32>
    %262 = vector.shape_cast %261 : vector<1x64x32xf32> to vector<64x32xf32>
    %cst_137 = arith.constant dense<0.000000e+00> : vector<8x32xf32>
    %263 = tpu.matmul %260, %262, %cst_137 {dimension_numbers = #tpu.dot_dimension_numbers<[1], [0], [0], [1], [0, 0, 1, 1], [], []>} : vector<8x64xf32>, vector<64x32xf32>, vector<8x32xf32> -> vector<8x32xf32>
    %c1_138 = arith.constant 1 : index
    %c0_139 = arith.constant 0 : index
    %c0_140 = arith.constant 0 : index
    %264 = vector.load %arg15[%c1_138, %c0_139, %c0_140] : memref<2x1x32xf32, #tpu.memory_space<vmem>>, vector<1x1x32xf32>
    %265 = vector.shape_cast %264 : vector<1x1x32xf32> to vector<1x32xf32>
    %266 = vector.broadcast %265 : vector<1x32xf32> to vector<8x32xf32>
    %267 = arith.addf %263, %266 : vector<8x32xf32>
    %268 = arith.addf %267, %240 : vector<8x32xf32>
    %c1_141 = arith.constant 1 : index
    %c0_142 = arith.constant 0 : index
    %c0_143 = arith.constant 0 : index
    %269 = vector.load %arg16[%c1_141, %c0_142, %c0_143] : memref<2x1x32xf32, #tpu.memory_space<vmem>>, vector<1x1x32xf32>
    %270 = vector.shape_cast %269 : vector<1x1x32xf32> to vector<1x32xf32>
    %c1_144 = arith.constant 1 : index
    %c0_145 = arith.constant 0 : index
    %c0_146 = arith.constant 0 : index
    %271 = vector.load %arg17[%c1_144, %c0_145, %c0_146] : memref<2x1x32xf32, #tpu.memory_space<vmem>>, vector<1x1x32xf32>
    %272 = vector.shape_cast %271 : vector<1x1x32xf32> to vector<1x32xf32>
    %cst_147 = arith.constant dense<0.000000e+00> : vector<8xf32>
    %273 = vector.multi_reduction <add>, %268, %cst_147 [1] : vector<8x32xf32> to vector<8xf32>
    %274 = vector.shape_cast %273 : vector<8xf32> to vector<8x1xf32>
    %cst_148 = arith.constant 3.200000e+01 : f32
    %275 = vector.broadcast %cst_148 : f32 to vector<8x1xf32>
    %276 = arith.divf %274, %275 : vector<8x1xf32>
    %277 = vector.broadcast %276 : vector<8x1xf32> to vector<8x32xf32>
    %278 = arith.subf %268, %277 : vector<8x32xf32>
    %279 = arith.mulf %278, %278 : vector<8x32xf32>
    %cst_149 = arith.constant dense<0.000000e+00> : vector<8xf32>
    %280 = vector.multi_reduction <add>, %279, %cst_149 [1] : vector<8x32xf32> to vector<8xf32>
    %281 = vector.shape_cast %280 : vector<8xf32> to vector<8x1xf32>
    %cst_150 = arith.constant 3.200000e+01 : f32
    %282 = vector.broadcast %cst_150 : f32 to vector<8x1xf32>
    %283 = arith.divf %281, %282 : vector<8x1xf32>
    %cst_151 = arith.constant 9.99999996E-13 : f32
    %284 = vector.broadcast %cst_151 : f32 to vector<8x1xf32>
    %285 = arith.addf %283, %284 : vector<8x1xf32>
    %286 = math.rsqrt %285 : vector<8x1xf32>
    %287 = vector.broadcast %286 : vector<8x1xf32> to vector<8x32xf32>
    %288 = arith.mulf %278, %287 : vector<8x32xf32>
    %289 = vector.broadcast %270 : vector<1x32xf32> to vector<8x32xf32>
    %290 = arith.mulf %288, %289 : vector<8x32xf32>
    %291 = vector.broadcast %272 : vector<1x32xf32> to vector<8x32xf32>
    %292 = arith.addf %290, %291 : vector<8x32xf32>
    %c0_152 = arith.constant 0 : index
    %c0_153 = arith.constant 0 : index
    %293 = vector.load %arg18[%c0_152, %c0_153] : memref<2x32xf32, #tpu.memory_space<vmem>>, vector<2x32xf32>
    %cst_154 = arith.constant dense<0.000000e+00> : vector<2x8xf32>
    %294 = tpu.matmul %293, %292, %cst_154 {dimension_numbers = #tpu.dot_dimension_numbers<[1], [1], [0], [0], [0, 0, 1, 0], [], []>} : vector<2x32xf32>, vector<8x32xf32>, vector<2x8xf32> -> vector<2x8xf32>
    %c0_155 = arith.constant 0 : index
    %c0_156 = arith.constant 0 : index
    %295 = vector.load %arg19[%c0_155, %c0_156] : memref<2x1xf32, #tpu.memory_space<vmem>>, vector<2x1xf32>
    %296 = vector.broadcast %295 : vector<2x1xf32> to vector<2x8xf32>
    %297 = arith.addf %294, %296 : vector<2x8xf32>
    %c0_157 = arith.constant 0 : index
    %c0_158 = arith.constant 0 : index
    %c0_159 = arith.constant 0 : index
    %298 = vector.load %arg20[%c0_157, %c0_158, %c0_159] : memref<1x2x8xf32, #tpu.memory_space<vmem>>, vector<1x2x8xf32>
    %299 = vector.shape_cast %298 : vector<1x2x8xf32> to vector<2x8xf32>
    %300 = vector.shape_cast %297 : vector<2x8xf32> to vector<1x2x8xf32>
    tpu.vector_store %arg20[%c0_157, %c0_158, %c0_159], %300 {strides = array<i32>} : memref<1x2x8xf32, #tpu.memory_space<vmem>>, vector<1x2x8xf32>,
    return
  }
  func.func @transform_0(%arg0: i32, %arg1: memref<2x8xi32, #tpu.memory_space<smem>>) -> (i32, i32) {
    %c0_i32 = arith.constant 0 : i32
    %c0_i32_0 = arith.constant 0 : i32
    %c0_i32_1 = arith.constant 0 : i32
    return %c0_i32, %c0_i32_0 : i32, i32
  }
  func.func @transform_1(%arg0: i32, %arg1: memref<2x8xi32, #tpu.memory_space<smem>>) -> (i32, i32) {
    %c0_i32 = arith.constant 0 : i32
    %c0_i32_0 = arith.constant 0 : i32
    %c0_i32_1 = arith.constant 0 : i32
    return %c0_i32, %c0_i32_0 : i32, i32
  }
  func.func @transform_2(%arg0: i32, %arg1: memref<2x8xi32, #tpu.memory_space<smem>>) -> (i32, i32) {
    %c0_i32 = arith.constant 0 : i32
    %c0_i32_0 = arith.constant 0 : i32
    %c0_i32_1 = arith.constant 0 : i32
    return %c0_i32, %c0_i32_0 : i32, i32
  }
  func.func @transform_3(%arg0: i32, %arg1: memref<2x8xi32, #tpu.memory_space<smem>>) -> (i32, i32) {
    %c0_i32 = arith.constant 0 : i32
    %c0_i32_0 = arith.constant 0 : i32
    %c0_i32_1 = arith.constant 0 : i32
    return %c0_i32, %c0_i32_0 : i32, i32
  }
  func.func @transform_4(%arg0: i32, %arg1: memref<2x8xi32, #tpu.memory_space<smem>>) -> (i32, i32, i32) {
    %c0_i32 = arith.constant 0 : i32
    %c0_i32_0 = arith.constant 0 : i32
    %c0_i32_1 = arith.constant 0 : i32
    %c0_i32_2 = arith.constant 0 : i32
    return %c0_i32, %c0_i32_0, %c0_i32_1 : i32, i32, i32
  }
  func.func @transform_5(%arg0: i32, %arg1: memref<2x8xi32, #tpu.memory_space<smem>>) -> (i32, i32, i32) {
    %c0_i32 = arith.constant 0 : i32
    %c0_i32_0 = arith.constant 0 : i32
    %c0_i32_1 = arith.constant 0 : i32
    %c0_i32_2 = arith.constant 0 : i32
    return %c0_i32, %c0_i32_0, %c0_i32_1 : i32, i32, i32
  }
  func.func @transform_6(%arg0: i32, %arg1: memref<2x8xi32, #tpu.memory_space<smem>>) -> (i32, i32, i32) {
    %c0_i32 = arith.constant 0 : i32
    %c0_i32_0 = arith.constant 0 : i32
    %c0_i32_1 = arith.constant 0 : i32
    %c0_i32_2 = arith.constant 0 : i32
    return %c0_i32, %c0_i32_0, %c0_i32_1 : i32, i32, i32
  }
  func.func @transform_7(%arg0: i32, %arg1: memref<2x8xi32, #tpu.memory_space<smem>>) -> (i32, i32, i32) {
    %c0_i32 = arith.constant 0 : i32
    %c0_i32_0 = arith.constant 0 : i32
    %c0_i32_1 = arith.constant 0 : i32
    %c0_i32_2 = arith.constant 0 : i32
    return %c0_i32, %c0_i32_0, %c0_i32_1 : i32, i32, i32
  }
  func.func @transform_8(%arg0: i32, %arg1: memref<2x8xi32, #tpu.memory_space<smem>>) -> (i32, i32, i32) {
    %c0_i32 = arith.constant 0 : i32
    %c0_i32_0 = arith.constant 0 : i32
    %c0_i32_1 = arith.constant 0 : i32
    %c0_i32_2 = arith.constant 0 : i32
    return %c0_i32, %c0_i32_0, %c0_i32_1 : i32, i32, i32
  }
  func.func @transform_9(%arg0: i32, %arg1: memref<2x8xi32, #tpu.memory_space<smem>>) -> (i32, i32, i32) {
    %c0_i32 = arith.constant 0 : i32
    %c0_i32_0 = arith.constant 0 : i32
    %c0_i32_1 = arith.constant 0 : i32
    %c0_i32_2 = arith.constant 0 : i32
    return %c0_i32, %c0_i32_0, %c0_i32_1 : i32, i32, i32
  }
  func.func @transform_10(%arg0: i32, %arg1: memref<2x8xi32, #tpu.memory_space<smem>>) -> (i32, i32, i32) {
    %c0_i32 = arith.constant 0 : i32
    %c0_i32_0 = arith.constant 0 : i32
    %c0_i32_1 = arith.constant 0 : i32
    %c0_i32_2 = arith.constant 0 : i32
    return %c0_i32, %c0_i32_0, %c0_i32_1 : i32, i32, i32
  }
  func.func @transform_11(%arg0: i32, %arg1: memref<2x8xi32, #tpu.memory_space<smem>>) -> (i32, i32, i32) {
    %c0_i32 = arith.constant 0 : i32
    %c0_i32_0 = arith.constant 0 : i32
    %c0_i32_1 = arith.constant 0 : i32
    %c0_i32_2 = arith.constant 0 : i32
    return %c0_i32, %c0_i32_0, %c0_i32_1 : i32, i32, i32
  }
  func.func @transform_12(%arg0: i32, %arg1: memref<2x8xi32, #tpu.memory_space<smem>>) -> (i32, i32, i32) {
    %c0_i32 = arith.constant 0 : i32
    %c0_i32_0 = arith.constant 0 : i32
    %c0_i32_1 = arith.constant 0 : i32
    %c0_i32_2 = arith.constant 0 : i32
    return %c0_i32, %c0_i32_0, %c0_i32_1 : i32, i32, i32
  }
  func.func @transform_13(%arg0: i32, %arg1: memref<2x8xi32, #tpu.memory_space<smem>>) -> (i32, i32, i32) {
    %c0_i32 = arith.constant 0 : i32
    %c0_i32_0 = arith.constant 0 : i32
    %c0_i32_1 = arith.constant 0 : i32
    %c0_i32_2 = arith.constant 0 : i32
    return %c0_i32, %c0_i32_0, %c0_i32_1 : i32, i32, i32
  }
  func.func @transform_14(%arg0: i32, %arg1: memref<2x8xi32, #tpu.memory_space<smem>>) -> (i32, i32, i32) {
    %c0_i32 = arith.constant 0 : i32
    %c0_i32_0 = arith.constant 0 : i32
    %c0_i32_1 = arith.constant 0 : i32
    %c0_i32_2 = arith.constant 0 : i32
    return %c0_i32, %c0_i32_0, %c0_i32_1 : i32, i32, i32
  }
  func.func @transform_15(%arg0: i32, %arg1: memref<2x8xi32, #tpu.memory_space<smem>>) -> (i32, i32, i32) {
    %c0_i32 = arith.constant 0 : i32
    %c0_i32_0 = arith.constant 0 : i32
    %c0_i32_1 = arith.constant 0 : i32
    %c0_i32_2 = arith.constant 0 : i32
    return %c0_i32, %c0_i32_0, %c0_i32_1 : i32, i32, i32
  }
  func.func @transform_16(%arg0: i32, %arg1: memref<2x8xi32, #tpu.memory_space<smem>>) -> (i32, i32) {
    %c0_i32 = arith.constant 0 : i32
    %c0_i32_0 = arith.constant 0 : i32
    %c0_i32_1 = arith.constant 0 : i32
    return %c0_i32, %c0_i32_0 : i32, i32
  }
  func.func @transform_17(%arg0: i32, %arg1: memref<2x8xi32, #tpu.memory_space<smem>>) -> (i32, i32) {
    %c0_i32 = arith.constant 0 : i32
    %c0_i32_0 = arith.constant 0 : i32
    %c0_i32_1 = arith.constant 0 : i32
    return %c0_i32, %c0_i32_0 : i32, i32
  }
  func.func @transform_18(%arg0: i32, %arg1: memref<2x8xi32, #tpu.memory_space<smem>>) -> (i32, i32, i32) {
    %c0_i32 = arith.constant 0 : i32
    %c0_i32_0 = arith.constant 0 : i32
    %c0_i32_1 = arith.constant 0 : i32
    return %arg0, %c0_i32, %c0_i32_0 : i32, i32, i32
  }
}

</mosaic_0001>

<bundles_post_ra>
// kernel: squad_model_forward.1
= control target key start
LH: loop header
LB: loop body
LE: loop exit
PB: predicated region body
PF: predicated region fallthrough
CT: control target
= control target key end

     0   :  { %s5348_s0 = inlined_call_operand.vmem [shape: s32[2,8], index: 0, kind: input, shape index: {}]   ;;  %s5349_s1 = inlined_call_operand.vmem [shape: f32[64,32], index: 1, kind: input, shape index: {}]   ;;  %s5350_s2 = inlined_call_operand.vmem [shape: f32[16,32], index: 2, kind: input, shape index: {}]   ;;  %s5351_s3 = inlined_call_operand.vmem [shape: f32[1,32], index: 3, kind: input, shape index: {}]   ;;  %s5352_s4 = inlined_call_operand.vmem [shape: f32[1,32], index: 4, kind: input, shape index: {}]   ;;  %s5353_s5 = inlined_call_operand.vmem [shape: f32[2,32,96], index: 5, kind: input, shape index: {}]   ;;  %s5354_s6 = inlined_call_operand.vmem [shape: f32[2,1,96], index: 6, kind: input, shape index: {}]   ;;  %s5355_s7 = inlined_call_operand.vmem [shape: f32[2,32,32], index: 7, kind: input, shape index: {}]   ;;  %s5356_s8 = inlined_call_operand.vmem [shape: f32[2,1,32], index: 8, kind: input, shape index: {}]   ;;  %s5357_s9 = inlined_call_operand.vmem [shape: f32[2,1,32], index: 9, kind: input, shape index: {}]   ;;  %s5358_s10 = inlined_call_operand.vmem [shape: f32[2,1,32], index: 10, kind: input, shape index: {}]   ;;  %s5359_s11 = inlined_call_operand.vmem [shape: f32[2,32,64], index: 11, kind: input, shape index: {}]   ;;  %s5360_s12 = inlined_call_operand.vmem [shape: f32[2,1,64], index: 12, kind: input, shape index: {}]   ;;  %s5361_s13 = inlined_call_operand.vmem [shape: f32[2,64,32], index: 13, kind: input, shape index: {}]   ;;  %s5362_s14 = inlined_call_operand.vmem [shape: f32[2,1,32], index: 14, kind: input, shape index: {}]   ;;  %s5363_s15 = inlined_call_operand.vmem [shape: f32[2,1,32], index: 15, kind: input, shape index: {}]   ;;  %s5364_s16 = inlined_call_operand.vmem [shape: f32[2,1,32], index: 16, kind: input, shape index: {}]   ;;  %s5365_s17 = inlined_call_operand.vmem [shape: f32[2,32], index: 17, kind: input, shape index: {}]   ;;  %s5366_s18 = inlined_call_operand.vmem [shape: f32[2,1], index: 18, kind: input, shape index: {}]   ;;  %s5367_s19 = inlined_call_operand.vmem [shape: f32[2,2,8], index: 19, kind: output, shape index: {}]  }
   0x1   :  { %5376 = sst [smem:[#allocation8_spill]] %s5348_s0 }
   0x2   :  { %5377 = sst [smem:[#allocation9_spill]] %s5349_s1  ;;  %s5387_s20 = sld [smem:[#allocation8_spill]] }
   0x3   :  { %5378 = sst [smem:[#allocation10_spill]] %s5350_s2 }
   0x4   :  { %5379 = sst [smem:[#allocation11_spill]] %s5351_s3 }
   0x5   :  { %5380 = sst [smem:[#allocation12_spill]] %s5360_s12 }
   0x6   :  { %5381 = sst [smem:[#allocation13_spill]] %s5362_s14 }
   0x7   :  { %5382 = sst [smem:[#allocation14_spill]] %s5363_s15 }
   0x8   :  { %5383 = sst [smem:[#allocation15_spill]] %s5364_s16  ;;  %s24_s12 = sshll.u32 %s5387_s20, 4  ;;  %s25_s12 = int_to_ptr.vmem [resolvable:$true] %s24_s12 }
   0x9   :  { %5384 = sst [smem:[#allocation16_spill]] %s5365_s17  ;;  %s4575_s21 = scalar_lea.vmem %s25_s12, 32 }
   0xa   :  { %5385 = sst [smem:[#allocation17_spill]] %s5366_s18  ;;  %p4576_p0 = scmp.ne.s32.totalorder %s25_s12, %s4575_s21 }
   0xb   :  { %5386 = sst [smem:[#allocation18_spill]] %s5367_s19  ;;  %p4580_p1 = scmp.lt.s32.totalorder %s25_s12, %s25_s12 }
   0xc   :  { %p4581_p2 = scmp.lt.s32.totalorder %s4575_s21, %s4575_s21 }
   0xe   :  { %p4582_p3 = por %p4581_p2, %p4580_p1 }
  0x10   :  { %p4583_p4 = pnand %p4582_p3, %p4576_p0 }
  0x12   :  { %4586 = shalt.err (!%p4583_p4)  }
  0x13   :  { %s4597_s1 = smov [#allocation4]  }
  0x14   :  { %27 = dma.vmem_to_smem %s25_s12, 32, %s4597_s1, [#allocation3] }
  0x15   :  { %4591 = dma.done.wait [#allocation3], 32 }
  0x16   :  { %4592 = vsyncadd [#allocation3], 4294967264 }
  0x17   :  { %29 = sfence }
  0x18   :  { %s4715_s22 = smov 0  }
  0x19 LB: > { %5388 = sst [smem:[#allocation6_spill]] %s4595_s22  ;;  %s4721_s2 = sadd.s32 4294967295, %s4595_s22   ;;  %s4595_s22 = sphi %s4715_s22, %s35_s22  }
  0x1a   : > { %5389 = sst [smem:[#allocation7_spill]] %s4721_s2  ;;  %p4073_p5 = scmp.ge.s32.totalorder %s4595_s22, 1 }
  0x1b   : > { %p509_p6 = scmp.lt.s32.totalorder %s4595_s22, 3 }
  0x1d   : > { %p510_p7 = pnand %p4073_p5, %p509_p6 }
  0x1e   : > { %s4075_s12 = sshll.u32 (!%p510_p7), %s4721_s2, 7  ;;  %vm565_vm0 = vcmask (!%p510_p7), 253952   ;;  %s5390_s22 = sld [smem:[#allocation9_spill]] (!%p510_p7)  ;;  %vm607_vm1 = vcmask (!%p510_p7), 261120   ;;  %v636_v17 = vld [vmem:[%s5353_s5] sm:$0xff] (!%p510_p7)  ;;  %v637_v18 = vld [vmem:[%s5353_s5 + $0x8] sm:$0xff] (!%p510_p7)  ;;  %v735_v43 = vlaneseq (!%p510_p7) }
  0x1f   : > { %513 = sbr.rel (%p510_p7) target bundleno = 5923 (0x1723), region = 92  ;;  %s562_s23 = sld [smem:[#allocation4 + %s4075_s12]] (!%p510_p7)  ;;  %v638_v19 = vld [vmem:[%s5353_s5 + $0x10] sm:$0xff] (!%p510_p7)  ;;  %v4598_v20 = vmov (!%p510_p7), 0.0|0.0   ;;  %v4446_v21 = vpack.c.bf16 (!%p510_p7), %v637_v18, %v636_v17  ;;  %v639_v22 = vld [vmem:[%s5353_s5 + $0x18] sm:$0xff] (!%p510_p7)  ;;  %vm4599_vm2 = vmmov (!%p510_p7), 0  }
  0x20   : > { %s567_s24 = sadd.s32 (!%p510_p7), 1, %s4075_s12  ;;  %s572_s3 = sadd.s32 (!%p510_p7), 2, %s4075_s12  ;;  %4445 = vmatprep.subr.bf16.mxu1 (!%p510_p7), %v4598_v20  ;;  %v4600_v23 = vmov (!%p510_p7), 0.0   ;;  %v4449_v24 = vpack.c.bf16 (!%p510_p7), %v639_v22, %v638_v19  ;;  %v4077_v31 = vld [vmem:[%s5352_s4] ss:$0 sm:$0xff] (!%p510_p7)  ;;  %v736_v45 = vshrl.u32 (!%p510_p7), %v735_v43, 7 }
  0x21   : > { %s568_s25 = sld [smem:[#allocation4 + %s567_s24]] (!%p510_p7)  ;;  %s577_s27 = sadd.s32 (!%p510_p7), 3, %s4075_s12  ;;  %4264 = vmatprep.mubr.msk.f32.mxu1 (!%p510_p7), %vm4599_vm2, %v4600_v23  ;;  %4277 = vmatprep.subr.mxu0 (!%p510_p7), %v4600_v23  ;;  %v4078_v34 = vld [vmem:[%s5354_s6] ss:$0 sm:$0xff] (!%p510_p7)  ;;  %v4605_v41 = vmov (!%p510_p7), 1983009808  }
  0x22   : > { %s573_s26 = sld [smem:[#allocation4 + %s572_s3]] (!%p510_p7)  ;;  %s582_s29 = sadd.s32 (!%p510_p7), 4, %s4075_s12  ;;  %4279 = vmatprep.mubr.msk.f32.mxu0 (!%p510_p7), %vm4599_vm2, %v4600_v23  ;;  %4447 = vmatpush3.bf16.msra.mxu1 (!%p510_p7), %v4446_v21  ;;  %v733_v42 = vunpack.c.l.s4 (!%p510_p7), %v4605_v41  ;;  %v4606_v46 = vmov (!%p510_p7), 1934713408   ;;  %vm1162_vm3 = vcmask (!%p510_p7), 64512   ;;  %vm1952_vm4 = vcmask (!%p510_p7), 130048  }
  0x23   : > { %s578_s28 = sld [smem:[#allocation4 + %s577_s27]] (!%p510_p7)  ;;  %s587_s30 = sadd.s32 (!%p510_p7), 5, %s4075_s12  ;;  %4448 = vmatprep.subr.bf16.mxu1 (!%p510_p7), %v4598_v20  ;;  %v765_v47 = vunpack.c.l.s4 (!%p510_p7), %v4606_v46  ;;  %vm1954_vm5 = vcmask (!%p510_p7), 195584   ;;  %vm2178_vm6 = vcmask (!%p510_p7), 523264   ;;  %vm4019_vm7 = vcmask (!%p510_p7), 58368  }
  0x24   : > { %s583_s0 = sld [smem:[#allocation4 + %s582_s29]] (!%p510_p7)  ;;  %s592_s21 = sadd.s32 (!%p510_p7), 6, %s4075_s12  ;;  %v734_v44 = vunpack.c.0.s8 (!%p510_p7), %v733_v42 }
  0x25   : > { %s588_s20 = sld [smem:[#allocation4 + %s587_s30]] (!%p510_p7)  ;;  %s5391_s17 = smov (!%p510_p7), %s5390_s22  ;;  %v766_v54 = vunpack.c.0.s8 (!%p510_p7), %v765_v47 }
  0x26   : > { %s563_s18 = scalar_lea.vmem %s5390_s22, %s562_s23  ;;  %s593_s16 = sld [smem:[#allocation4 + %s592_s21]]  ;;  %4450 = vmatpush3.bf16.msra.mxu1 %v4449_v24  ;;  %v4824_v51 = vsub.s32 %v734_v44, %v736_v45 }
  0x27   : > { %v564_v0 = vld [vmem:[%s563_s18] sm:$0x1]  ;;  %s569_s24 = scalar_lea.vmem %s5391_s17, %s568_s25  ;;  %s597_s14 = sadd.s32 7, %s4075_s12  ;;  %4267 = vmatprep.subr.mxu1 %v4600_v23  ;;  %v4834_v60 = vsub.s32 %v766_v54, %v736_v45 }
  0x28   : > { %566 = vst.msk [vmem:[#allocation2] sm:$0x1] %vm565_vm0, %v564_v0  ;;  %v570_v1 = vld [vmem:[%s569_s24] sm:$0x1]  ;;  %s574_s29 = scalar_lea.vmem %s5391_s17, %s573_s26  ;;  %s598_s30 = sld [smem:[#allocation4 + %s597_s14]] }
  0x29   : > { %571 = vst.msk [vmem:[#allocation2 + $0x1] sm:$0x1] %vm565_vm0, %v570_v1  ;;  %v575_v2 = vld [vmem:[%s574_s29] sm:$0x1]  ;;  %s579_s18 = scalar_lea.vmem %s5391_s17, %s578_s28  ;;  %s5392_s27 = sld [smem:[#allocation10_spill]] }
  0x2a   : > { %576 = vst.msk [vmem:[#allocation2 + $0x2] sm:$0x1] %vm565_vm0, %v575_v2  ;;  %v580_v3 = vld [vmem:[%s579_s18] sm:$0x1]  ;;  %s584_s12 = scalar_lea.vmem %s5391_s17, %s583_s0  ;;  %s5393_s25 = sld [smem:[#allocation11_spill]] }
  0x2b   : > { %581 = vst.msk [vmem:[#allocation2 + $0x3] sm:$0x1] %vm565_vm0, %v580_v3  ;;  %v585_v4 = vld [vmem:[%s584_s12] sm:$0x1]  ;;  %s589_s14 = scalar_lea.vmem %s5391_s17, %s588_s20  ;;  %s4601_s0 = smov 104  }
  0x2c   : > { %586 = vst.msk [vmem:[#allocation2 + $0x4] sm:$0x1] %vm565_vm0, %v585_v4  ;;  %v590_v5 = vld [vmem:[%s589_s14] sm:$0x1]  ;;  %s594_s28 = scalar_lea.vmem %s5391_s17, %s593_s16  ;;  %s4602_s1 = smov 120  }
  0x2d   : > { %591 = vst.msk [vmem:[#allocation2 + $0x5] sm:$0x1] %vm565_vm0, %v590_v5  ;;  %v595_v6 = vld [vmem:[%s594_s28] sm:$0x1]  ;;  %s4604_s20 = smov 96   ;;  %s4607_s3 = smov 64  }
  0x2e   : > { %596 = vst.msk [vmem:[#allocation2 + $0x6] sm:$0x1] %vm565_vm0, %v595_v6  ;;  %s599_s24 = scalar_lea.vmem %s5391_s17, %s598_s30  ;;  %s4608_s2 = smov 16  }
  0x2f   : > { %v600_v7 = vld [vmem:[%s599_s24] sm:$0x1]  ;;  %s4603_s24 = smov 112   ;;  %s4609_s12 = smov 8  }
  0x30   : > { %601 = vst.msk [vmem:[#allocation2 + $0x7] sm:$0x1] %vm565_vm0, %v600_v7  ;;  %v603_v8 = vld [vmem:[%s5392_s27] sm:$0xff]  ;;  %s4610_s23 = smov 24   ;;  %s5394_s16 = sld [smem:[#allocation12_spill]] }
  0x31   : > { %v4076_v29 = vld [vmem:[%s5393_s25] ss:$0 sm:$0xff]  ;;  %s5395_s19 = sld [smem:[#allocation13_spill]]  ;;  %s5396_s30 = sld [smem:[#allocation14_spill]] }
  0x32   : > { %s5397_s15 = sld [smem:[#allocation15_spill]]  ;;  %s5401_s26 = sld [smem:[#allocation18_spill]] }
  0x37   : > { %v602_v9 = vld [vmem:[#allocation2] sm:$0xff] }
  0x38   : > { %v604_v10 = vadd.f32 %v603_v8, %v602_v9 }
  0x3a   : > { %v608_v11 = vsel %vm607_vm1, %v604_v10, 0.0 }
  0x3b   : > { %609 = vadd.xlane.f32.xlu0 %v608_v11 }
  0xc8   : > { %v610_v12 = vpop.xlane.xlu0 %609 }
  0xc9   : > { %v612_v13 = vmul.f32 0.03125, %v610_v12 }
  0xcb   : > { %v613_v14 = vsub.f32 %v604_v10, %v612_v13 }
  0xcd   : > { %v614_v15 = vmul.f32 %v613_v14, %v613_v14 }
  0xcf   : > { %v615_v16 = vsel %vm607_vm1, %v614_v15, 0.0 }
  0xd0   : > { %616 = vadd.xlane.f32.xlu0 %v615_v16 }
 0x15d   : > { %v617_v25 = vpop.xlane.xlu0 %616 }
 0x15e   : > { %v618_v26 = vmul.f32 0.03125, %v617_v25 }
 0x160   : > { %v619_v27 = vadd.f32 1e-12, %v618_v26 }
 0x162   : > { %4529 = vrsqrt.f32 %v619_v27 }
 0x16c   : > { %v4530_v28 = vpop.eup %4529 }
 0x16d   : > { %v621_v30 = vmul.f32 %v4530_v28, %v613_v14 }
 0x16f   : > { %v628_v32 = vmul.f32 %v4076_v29, %v621_v30 }
 0x171   : > { %v4789_v33 = vadd.f32 %v4077_v31, %v628_v32 }
 0x173   : > { %4265 = vmatmul.mubr.msk.f32.vlgmr.msra.gmra.mrb[0].mxu1 %vm607_vm1, %v4789_v33 }
 0x174   : > { %4269 = vmatprep.mubr.msk.f32.mxu1 %vm4599_vm2, %v4600_v23 }
 0x246   : > { %v716_v35 = vpop.f32.mrb[0].mxu1 }
 0x247   : > { %v4798_v36 = vadd.f32 %v4078_v34, %v716_v35  ;;  %v4266_v37 = vpop.f32.mrb[1].mxu1 }
 0x249   : > { %727 = vrot.lane.b32.xlu0 %v4798_v36, %s4601_s0  ;;  %721 = vrot.lane.b32.xlu1 %v4798_v36, %s4602_s1 }
 0x24d   : > { %724 = vrot.lane.b32.xlu1 %v4798_v36, %s4603_s24 }
 0x251   : > { %866 = vrot.lane.b32.xlu1 %v4798_v36, %s4604_s20 }
 0x2bb   : > { %v4808_v38 = vpop.permute.xlu1 %721  ;;  %v4816_v40 = vpop.permute.xlu0 %727 }
 0x2bc   : > { %868 = vrot.lane.b32.xlu1 %v4808_v38, %s4604_s20  ;;  %v746_v52 = vcombine.low %v4808_v38, %v4816_v40  ;;  %v747_v53 = vcombine.high %v4808_v38, %v4816_v40 }
 0x2be   : > { %v754_v58 = vrot.slane %v746_v52, %v4824_v51  ;;  %v761_v59 = vrot.slane %v747_v53, %v4824_v51 }
 0x2bf   : > { %v4812_v39 = vpop.permute.xlu1 %724 }
 0x2c0   : > { %870 = vrot.lane.b32.xlu1 %v4812_v39, %s4604_s20  ;;  %v730_v48 = vcombine.low %v4798_v36, %v4812_v39  ;;  %v731_v49 = vcombine.high %v4798_v36, %v4812_v39 }
 0x2c2   : > { %v738_v55 = vrot.slane %v730_v48, %v4824_v51  ;;  %v745_v56 = vrot.slane %v731_v49, %v4824_v51 }
 0x2c3   : > { %v867_v50 = vpop.permute.xlu1 %866 }
 0x2c4   : > { %872 = vrot.lane.b32.xlu1 %v4816_v40, %s4604_s20  ;;  %v762_v61 = vcombine.low %v738_v55, %v754_v58  ;;  %v763_v62 = vcombine.high %v738_v55, %v754_v58  ;;  %v778_v63 = vcombine.low %v745_v56, %v761_v59  ;;  %v779_v0 = vcombine.high %v745_v56, %v761_v59 }
 0x2c6   : > { %v770_v4 = vrot.slane %v762_v61, %v4834_v60  ;;  %v777_v5 = vrot.slane %v763_v62, %v4834_v60  ;;  %v786_v6 = vrot.slane %v778_v63, %v4834_v60  ;;  %v793_v7 = vrot.slane %v779_v0, %v4834_v60 }
 0x2c8   : > { %v798_v15 = vcombine.low %v770_v4, %v777_v5  ;;  %v4080_v16 = vcombine.high %v770_v4, %v777_v5  ;;  %v814_v17 = vcombine.low %v786_v6, %v793_v7  ;;  %v4081_v18 = vcombine.high %v786_v6, %v793_v7 }
 0x2ca   : > { %v805_v29 = vrot.slane %v798_v15, %v4824_v51  ;;  %v813_v30 = vrot.slane %v4080_v16, %v4824_v51  ;;  %v821_v31 = vrot.slane %v814_v17, %v4824_v51  ;;  %v829_v32 = vrot.slane %v4081_v18, %v4824_v51 }
 0x2cc   : > { %v830_v46 = vcombine.low %v805_v29, %v813_v30  ;;  %v846_v47 = vcombine.low %v821_v31, %v829_v32  ;;  %v831_v48 = vcombine.high %v805_v29, %v813_v30  ;;  %v847_v49 = vcombine.high %v821_v31, %v829_v32 }
 0x2ce   : > { %v838_v59 = vrot.slane %v830_v46, %v4834_v60  ;;  %v854_v61 = vrot.slane %v846_v47, %v4834_v60  ;;  %v845_v62 = vrot.slane %v831_v48, %v4834_v60  ;;  %v861_v63 = vrot.slane %v847_v49, %v4834_v60 }
 0x2d0   : > { %v863_v5 = vcombine.high %v838_v59, %v854_v61  ;;  %v865_v7 = vcombine.high %v845_v62, %v861_v63 }
 0x32e   : > { %v869_v57 = vpop.permute.xlu1 %868 }
 0x332   : > { %v871_v1 = vpop.permute.xlu1 %870 }
 0x333   : > { %v878_v2 = vcombine.low %v867_v50, %v871_v1  ;;  %v879_v3 = vcombine.high %v867_v50, %v871_v1 }
 0x335   : > { %v886_v11 = vrot.slane %v878_v2, %v4824_v51  ;;  %v893_v12 = vrot.slane %v879_v3, %v4824_v51  ;;  %v862_v2 = vcombine.low %v838_v59, %v854_v61  ;;  %v864_v3 = vcombine.low %v845_v62, %v861_v63 }
 0x336   : > { %v873_v8 = vpop.permute.xlu1 %872 }
 0x337   : > { %v894_v9 = vcombine.low %v869_v57, %v873_v8  ;;  %v895_v10 = vcombine.high %v869_v57, %v873_v8 }
 0x339   : > { %v902_v13 = vrot.slane %v894_v9, %v4824_v51  ;;  %v909_v14 = vrot.slane %v895_v10, %v4824_v51 }
 0x33b   : > { %v910_v19 = vcombine.low %v886_v11, %v902_v13  ;;  %v911_v21 = vcombine.high %v886_v11, %v902_v13  ;;  %v926_v22 = vcombine.low %v893_v12, %v909_v14  ;;  %v927_v24 = vcombine.high %v893_v12, %v909_v14 }
 0x33d   : > { %v918_v25 = vrot.slane %v910_v19, %v4834_v60  ;;  %v925_v26 = vrot.slane %v911_v21, %v4834_v60  ;;  %v934_v27 = vrot.slane %v926_v22, %v4834_v60  ;;  %v941_v28 = vrot.slane %v927_v24, %v4834_v60 }
 0x33f   : > { %v946_v34 = vcombine.low %v918_v25, %v925_v26  ;;  %v4082_v35 = vcombine.high %v918_v25, %v925_v26  ;;  %v962_v37 = vcombine.low %v934_v27, %v941_v28  ;;  %v4083_v41 = vcombine.high %v934_v27, %v941_v28 }
 0x341   : > { %v953_v42 = vrot.slane %v946_v34, %v4824_v51  ;;  %v961_v43 = vrot.slane %v4082_v35, %v4824_v51  ;;  %v969_v44 = vrot.slane %v962_v37, %v4824_v51  ;;  %v977_v45 = vrot.slane %v4083_v41, %v4824_v51 }
 0x343   : > { %v978_v50 = vcombine.low %v953_v42, %v961_v43  ;;  %v994_v52 = vcombine.low %v969_v44, %v977_v45  ;;  %v979_v53 = vcombine.high %v953_v42, %v961_v43  ;;  %v995_v54 = vcombine.high %v969_v44, %v977_v45 }
 0x345   : > { %v986_v55 = vrot.slane %v978_v50, %v4834_v60  ;;  %v1002_v56 = vrot.slane %v994_v52, %v4834_v60  ;;  %v993_v57 = vrot.slane %v979_v53, %v4834_v60  ;;  %v1009_v58 = vrot.slane %v995_v54, %v4834_v60 }
 0x347   : > { %v1010_v0 = vcombine.low %v986_v55, %v1002_v56  ;;  %v1012_v1 = vcombine.low %v993_v57, %v1009_v58  ;;  %v1011_v4 = vcombine.high %v986_v55, %v1002_v56  ;;  %v1013_v6 = vcombine.high %v993_v57, %v1009_v58 }
 0x349   : > { %4268 = vmatpush3.xpose.msk.msra.mxu1 %vm1162_vm3, %v1010_v0  ;;  %4278 = vmatpush3.xpose.msk.msra.mxu0 %vm1162_vm3, %v1012_v1 }
 0x34a   : > { %4272 = vmatprep.subr.mxu1 %v4600_v23  ;;  %4287 = vmatprep.subr.mxu0 %v4600_v23 }
 0x34c   : > { %4270 = vmatmul.mubr.msk.f32.vlgmr.msra.gmra.mrb[2].mxu1 %vm1162_vm3, %v862_v2  ;;  %4280 = vmatmul.mubr.msk.f32.vlgmr.msra.gmra.mrb[0].mxu0 %vm1162_vm3, %v864_v3 }
 0x34d   : > { %4273 = vmatpush3.xpose.msk.msra.mxu1 %vm1162_vm3, %v1011_v4  ;;  %4274 = vmatprep.mubr.msk.f32.mxu1 %vm4599_vm2, %v4600_v23 }
 0x34e   : > { %4282 = vmatprep.subr.mxu1 %v4600_v23  ;;  %4289 = vmatprep.mubr.msk.f32.mxu0 %vm4599_vm2, %v4600_v23 }
 0x350   : > { %4275 = vmatmul.mubr.msk.f32.vlgmr.msra.gmra.mrb[4].mxu1 %vm1162_vm3, %v863_v5 }
 0x351   : > { %4283 = vmatpush3.xpose.msk.msra.mxu1 %vm1162_vm3, %v1013_v6  ;;  %4284 = vmatprep.mubr.msk.f32.mxu1 %vm4599_vm2, %v4600_v23 }
 0x352   : > { %4292 = vmatprep.subr.mxu1 %v4600_v23 }
 0x354   : > { %4285 = vmatmul.mubr.msk.f32.vlgmr.msra.gmra.mrb[6].mxu1 %vm1162_vm3, %v865_v7 }
 0x355   : > { %4294 = vmatprep.mubr.msk.f32.mxu1 %vm4599_vm2, %v4600_v23 }
 0x41f   : > { %v1235_v8 = vpop.f32.mrb[2].mxu1  ;;  %v1387_v9 = vpop.f32.mrb[0].mxu0 }
 0x420   : > { %v4271_v10 = vpop.f32.mrb[3].mxu1  ;;  %v4281_v11 = vpop.f32.mrb[1].mxu0  ;;  %v1467_v12 = vsel %vm1162_vm3, %v1235_v8, -inf  ;;  %v1473_v15 = vsel %vm1162_vm3, %v1387_v9, -inf }
 0x421   : > { %1468 = vmax.xlane.f32.xlu1 %v1467_v12 }
 0x423   : > { %v1311_v13 = vpop.f32.mrb[4].mxu1 }
 0x424   : > { %v4276_v14 = vpop.f32.mrb[5].mxu1  ;;  %v1470_v16 = vsel %vm1162_vm3, %v1311_v13, -inf }
 0x425   : > { %1474 = vmax.xlane.f32.xlu1 %v1473_v15  ;;  %1471 = vmax.xlane.f32.xlu0 %v1470_v16 }
 0x427   : > { %v1463_v17 = vpop.f32.mrb[6].mxu1 }
 0x428   : > { %v4286_v18 = vpop.f32.mrb[7].mxu1  ;;  %v1476_v19 = vsel %vm1162_vm3, %v1463_v17, -inf }
 0x429   : > { %1477 = vmax.xlane.f32.xlu0 %v1476_v19 }
 0x436   : > { %1014 = vrot.lane.b32.xlu1 %v4798_v36, %s4607_s3 }
 0x4ae   : > { %v1469_v21 = vpop.xlane.xlu1 %1468 }
 0x4af   : > { %v1479_v22 = vsub.f32 %v1235_v8, %v1469_v21 }
 0x4b1   : > { %v1483_v24 = vmul.f32 1.442695, %v1479_v22 }
 0x4b2   : > { %v1475_v25 = vpop.xlane.xlu1 %1474  ;;  %v1472_v26 = vpop.xlane.xlu0 %1471 }
 0x4b3   : > { %4531 = vpow2.f32 %v1483_v24  ;;  %v1481_v27 = vsub.f32 %v1387_v9, %v1475_v25  ;;  %v1480_v28 = vsub.f32 %v1311_v13, %v1472_v26 }
 0x4b5   : > { %v1487_v29 = vmul.f32 1.442695, %v1481_v27  ;;  %v1485_v30 = vmul.f32 1.442695, %v1480_v28 }
 0x4b6   : > { %v1478_v31 = vpop.xlane.xlu0 %1477  ;;  %v1015_v46 = vpop.permute.xlu1 %1014 }
 0x4b7   : > { %4533 = vpow2.f32 %v1487_v29  ;;  %v1482_v32 = vsub.f32 %v1463_v17, %v1478_v31 }
 0x4b8   : > { %4535 = vpow2.f32 %v1485_v30 }
 0x4b9   : > { %v1489_v34 = vmul.f32 1.442695, %v1482_v32 }
 0x4bb   : > { %4537 = vpow2.f32 %v1489_v34 }
 0x4bd   : > { %v4890_v35 = vpop.eup %4531 }
 0x4be   : > { %v1491_v36 = vsel %vm1162_vm3, %v4890_v35, 0.0 }
 0x4bf   : > { %1492 = vadd.xlane.f32.xlu1 %v1491_v36 }
 0x4c1   : > { %v4894_v37 = vpop.eup %4533 }
 0x4c2   : > { %v4536_v41 = vpop.eup %4535  ;;  %v1497_v42 = vsel %vm1162_vm3, %v4894_v37, 0.0 }
 0x4c3   : > { %1498 = vadd.xlane.f32.xlu1 %v1497_v42  ;;  %v1494_v43 = vsel %vm1162_vm3, %v4536_v41, 0.0 }
 0x4c4   : > { %1495 = vadd.xlane.f32.xlu0 %v1494_v43 }
 0x4c5   : > { %v4899_v44 = vpop.eup %4537 }
 0x4c6   : > { %v1500_v45 = vsel %vm1162_vm3, %v4899_v44, 0.0 }
 0x4c8   : > { %1501 = vadd.xlane.f32.xlu0 %v1500_v45 }
 0x4d4   : > { %1018 = vrot.lane.b32.xlu1 %v4812_v39, %s4607_s3 }
 0x4d8   : > { %1020 = vrot.lane.b32.xlu1 %v4816_v40, %s4607_s3 }
 0x4de   : > { %1016 = vrot.lane.b32.xlu0 %v4808_v38, %s4607_s3 }
 0x54c   : > { %v1493_v47 = vpop.xlane.xlu1 %1492 }
 0x54d   : > { %4539 = vrcp.f32 %v1493_v47 }
 0x550   : > { %v1499_v48 = vpop.xlane.xlu1 %1498 }
 0x551   : > { %v1496_v49 = vpop.xlane.xlu0 %1495 }
 0x552   : > { %4541 = vrcp.f32 %v1496_v49 }
 0x553   : > { %4543 = vrcp.f32 %v1499_v48 }
 0x554   : > { %v1019_v50 = vpop.permute.xlu1 %1018 }
 0x555   : > { %v1502_v52 = vpop.xlane.xlu0 %1501  ;;  %v1026_v53 = vcombine.low %v1015_v46, %v1019_v50  ;;  %v1027_v54 = vcombine.high %v1015_v46, %v1019_v50 }
 0x556   : > { %4545 = vrcp.f32 %v1502_v52 }
 0x557   : > { %v1034_v39 = vrot.slane %v1026_v53, %v4824_v51  ;;  %v1041_v40 = vrot.slane %v1027_v54, %v4824_v51  ;;  %v4540_v13 = vpop.eup %4539 }
 0x558   : > { %v1021_v55 = vpop.permute.xlu1 %1020  ;;  %v1507_v29 = vmul.f32 %v4540_v13, %v4890_v35  ;;  %v1956_v35 = vld [vmem:[%s5355_s7] sm:$0xff] }
 0x559   : > { %v1017_v56 = vpop.permute.xlu0 %1016 }
 0x55a   : > { %v1042_v57 = vcombine.low %v1017_v56, %v1021_v55  ;;  %v1043_v58 = vcombine.high %v1017_v56, %v1021_v55 }
 0x55c   : > { %v1050_v59 = vrot.slane %v1042_v57, %v4824_v51  ;;  %v1057_v38 = vrot.slane %v1043_v58, %v4824_v51  ;;  %v4542_v18 = vpop.eup %4541 }
 0x55d   : > { %v4544_v22 = vpop.eup %4543  ;;  %v1508_v30 = vmul.f32 %v4542_v18, %v4536_v41 }
 0x55e   : > { %v1058_v61 = vcombine.low %v1034_v39, %v1050_v59  ;;  %v1059_v62 = vcombine.high %v1034_v39, %v1050_v59  ;;  %v1074_v63 = vcombine.low %v1041_v40, %v1057_v38  ;;  %v1075_v0 = vcombine.high %v1041_v40, %v1057_v38 }
 0x55f   : > { %v1509_v34 = vmul.f32 %v4544_v22, %v4894_v37  ;;  %v1957_v37 = vld [vmem:[%s5355_s7 + $0x8] sm:$0xff] }
 0x560   : > { %v1066_v1 = vrot.slane %v1058_v61, %v4834_v60  ;;  %v1073_v2 = vrot.slane %v1059_v62, %v4834_v60  ;;  %v1082_v3 = vrot.slane %v1074_v63, %v4834_v60  ;;  %v1089_v4 = vrot.slane %v1075_v0, %v4834_v60  ;;  %v4546_v28 = vpop.eup %4545  ;;  %v1958_v61 = vld [vmem:[%s5355_s7 + $0x10] sm:$0xff]  ;;  %v1959_v62 = vld [vmem:[%s5355_s7 + $0x18] sm:$0xff] }
 0x561   : > { %v1510_v36 = vmul.f32 %v4546_v28, %v4899_v44  ;;  %v4452_v41 = vpack.c.bf16 %v1957_v37, %v1956_v35 }
 0x562   : > { %v1094_v5 = vcombine.low %v1066_v1, %v1073_v2  ;;  %v4084_v6 = vcombine.high %v1066_v1, %v1073_v2  ;;  %v1110_v7 = vcombine.low %v1082_v3, %v1089_v4  ;;  %v4085_v8 = vcombine.high %v1082_v3, %v1089_v4 }
 0x563   : > { %v4455_v3 = vpack.c.bf16 %v1959_v62, %v1958_v61  ;;  %v2164_v61 = vld [vmem:[%s5361_s13 + $0x8] sm:$0xff] }
 0x564   : > { %v1101_v9 = vrot.slane %v1094_v5, %v4824_v51  ;;  %v1109_v10 = vrot.slane %v4084_v6, %v4824_v51  ;;  %v1117_v11 = vrot.slane %v1110_v7, %v4824_v51  ;;  %v1125_v12 = vrot.slane %v4085_v8, %v4824_v51 }
 0x566   : > { %v1126_v14 = vcombine.low %v1101_v9, %v1109_v10  ;;  %v1142_v15 = vcombine.low %v1117_v11, %v1125_v12  ;;  %v1127_v16 = vcombine.high %v1101_v9, %v1109_v10  ;;  %v1143_v17 = vcombine.high %v1117_v11, %v1125_v12 }
 0x568   : > { %v1134_v19 = vrot.slane %v1126_v14, %v4834_v60  ;;  %v1150_v21 = vrot.slane %v1142_v15, %v4834_v60  ;;  %v1141_v24 = vrot.slane %v1127_v16, %v4834_v60  ;;  %v1157_v25 = vrot.slane %v1143_v17, %v4834_v60 }
 0x56a   : > { %v1158_v26 = vcombine.low %v1134_v19, %v1150_v21  ;;  %v1159_v27 = vcombine.high %v1134_v19, %v1150_v21  ;;  %v1160_v31 = vcombine.low %v1141_v24, %v1157_v25  ;;  %v1161_v32 = vcombine.high %v1141_v24, %v1157_v25 }
 0x56c   : > { %4288 = vmatpush3.msra.mxu0 %v1158_v26  ;;  %4293 = vmatpush3.msra.mxu1 %v1159_v27 }
 0x56d   : > { %4290 = vmatmul.mubr.msk.f32.vlgmr.msra.gmra.mrb[2].mxu0 %vm1162_vm3, %v1507_v29  ;;  %4295 = vmatmul.mubr.msk.f32.vlgmr.msra.gmra.mrb[8].mxu1 %vm1162_vm3, %v1508_v30 }
 0x56e   : > { %4297 = vmatprep.subr.mxu0 %v4600_v23  ;;  %4302 = vmatprep.subr.mxu1 %v4600_v23 }
 0x56f   : > { %4298 = vmatpush3.msra.mxu0 %v1160_v31  ;;  %4303 = vmatpush3.msra.mxu1 %v1161_v32  ;;  %v4100_v32 = vld [vmem:[%s5356_s8] ss:$0 sm:$0xff] }
 0x570   : > { %4299 = vmatprep.mubr.msk.f32.mxu0 %vm4599_vm2, %v4600_v23  ;;  %4304 = vmatprep.mubr.msk.f32.mxu1 %vm4599_vm2, %v4600_v23 }
 0x571   : > { %4300 = vmatmul.mubr.msk.f32.vlgmr.msra.gmra.mrb[4].mxu0 %vm1162_vm3, %v1509_v34  ;;  %4305 = vmatmul.mubr.msk.f32.vlgmr.msra.gmra.mrb[10].mxu1 %vm1162_vm3, %v1510_v36 }
 0x572   : > { %4451 = vmatprep.subr.bf16.mxu0 %v4598_v20  ;;  %4315 = vmatprep.mubr.msk.f32.mxu0 %vm4599_vm2, %v4600_v23 }
 0x573   : > { %4457 = vmatprep.subr.bf16.mxu1 %v4598_v20  ;;  %4326 = vmatprep.mubr.msk.f32.mxu1 %vm4599_vm2, %v4600_v23 }
 0x574   : > { %4453 = vmatpush3.bf16.msra.mxu0 %v4452_v41 }
 0x575   : > { %4454 = vmatprep.subr.bf16.mxu0 %v4598_v20 }
 0x578   : > { %4456 = vmatpush3.bf16.msra.mxu0 %v4455_v3  ;;  %v2168_v3 = vld [vmem:[%s5361_s13 + $0x28] sm:$0xff] }
 0x579   : > { %4463 = vmatprep.subr.bf16.mxu0 %v4598_v20 }
 0x640   : > { %v1580_v42 = vpop.f32.mrb[2].mxu0  ;;  %v1653_v43 = vpop.f32.mrb[8].mxu1 }
 0x641   : > { %v4291_v44 = vpop.f32.mrb[3].mxu0  ;;  %v4296_v45 = vpop.f32.mrb[9].mxu1 }
 0x644   : > { %v1726_v46 = vpop.f32.mrb[4].mxu0  ;;  %v1799_v47 = vpop.f32.mrb[10].mxu1 }
 0x645   : > { %v1803_v48 = vcombine.low %v1580_v42, %v1726_v46  ;;  %v1804_v49 = vcombine.high %v1580_v42, %v1726_v46  ;;  %v1819_v50 = vcombine.low %v1653_v43, %v1799_v47  ;;  %v1820_v52 = vcombine.high %v1653_v43, %v1799_v47  ;;  %v4301_v53 = vpop.f32.mrb[5].mxu0  ;;  %v4306_v54 = vpop.f32.mrb[11].mxu1  ;;  %v2070_v47 = vld [vmem:[%s5359_s11] sm:$0xff] }
 0x647   : > { %v1811_v55 = vrot.slane %v1803_v48, %v4824_v51  ;;  %v1818_v56 = vrot.slane %v1804_v49, %v4824_v51  ;;  %v1827_v57 = vrot.slane %v1819_v50, %v4824_v51  ;;  %v1834_v58 = vrot.slane %v1820_v52, %v4824_v51  ;;  %v2071_v48 = vld [vmem:[%s5359_s11 + $0x8] sm:$0xff]  ;;  %v2073_v50 = vld [vmem:[%s5359_s11 + $0x18] sm:$0xff] }
 0x648   : > { %v4458_v49 = vpack.c.bf16 %v2071_v48, %v2070_v47  ;;  %v4108_v48 = vld [vmem:[%s5396_s30] ss:$0 sm:$0xff] }
 0x649   : > { %v1835_v39 = vcombine.low %v1811_v55, %v1827_v57  ;;  %v1836_v40 = vcombine.high %v1811_v55, %v1827_v57  ;;  %v1851_v59 = vcombine.low %v1818_v56, %v1834_v58  ;;  %v1852_v38 = vcombine.high %v1818_v56, %v1834_v58  ;;  %v4102_v57 = vld [vmem:[%s5357_s9] ss:$0 sm:$0xff] }
 0x64a   : > { %4459 = vmatpush3.bf16.msra.mxu1 %v4458_v49 }
 0x64b   : > { %v1843_v63 = vrot.slane %v1835_v39, %v4834_v60  ;;  %v1850_v0 = vrot.slane %v1836_v40, %v4834_v60  ;;  %v1859_v1 = vrot.slane %v1851_v59, %v4834_v60  ;;  %v1866_v2 = vrot.slane %v1852_v38, %v4834_v60  ;;  %4460 = vmatprep.subr.bf16.mxu1 %v4598_v20  ;;  %v4103_v39 = vld [vmem:[%s5358_s10] ss:$0 sm:$0xff] }
 0x64c   : > { %v2163_v38 = vld [vmem:[%s5361_s13] sm:$0xff] }
 0x64d   : > { %v1871_v4 = vcombine.low %v1843_v63, %v1850_v0  ;;  %v4098_v5 = vcombine.high %v1843_v63, %v1850_v0  ;;  %v1887_v6 = vcombine.low %v1859_v1, %v1866_v2  ;;  %v4099_v7 = vcombine.high %v1859_v1, %v1866_v2  ;;  %v2165_v63 = vld [vmem:[%s5361_s13 + $0x10] sm:$0xff]  ;;  %v2166_v0 = vld [vmem:[%s5361_s13 + $0x18] sm:$0xff]  ;;  %v2167_v2 = vld [vmem:[%s5361_s13 + $0x20] sm:$0xff] }
 0x64e   : > { %v4464_v62 = vpack.c.bf16 %v2164_v61, %v2163_v38  ;;  %v4467_v1 = vpack.c.bf16 %v2166_v0, %v2165_v63 }
 0x64f   : > { %v1878_v8 = vrot.slane %v1871_v4, %v4824_v51  ;;  %v1886_v9 = vrot.slane %v4098_v5, %v4824_v51  ;;  %v1894_v10 = vrot.slane %v1887_v6, %v4824_v51  ;;  %v1902_v11 = vrot.slane %v4099_v7, %v4824_v51  ;;  %v2169_v5 = vld [vmem:[%s5361_s13 + $0x30] sm:$0xff]  ;;  %v2170_v6 = vld [vmem:[%s5361_s13 + $0x38] sm:$0xff] }
 0x650   : > { %v4470_v4 = vpack.c.bf16 %v2168_v3, %v2167_v2  ;;  %v4473_v7 = vpack.c.bf16 %v2170_v6, %v2169_v5 }
 0x651   : > { %v1904_v12 = vcombine.high %v1878_v8, %v1886_v9  ;;  %v1920_v13 = vcombine.high %v1894_v10, %v1902_v11  ;;  %v1903_v14 = vcombine.low %v1878_v8, %v1886_v9  ;;  %v1919_v15 = vcombine.low %v1894_v10, %v1902_v11  ;;  %v4104_v8 = vld [vmem:[%s5394_s16] ss:$0 sm:$0xff] }
 0x653   : > { %v1918_v16 = vrot.slane %v1904_v12, %v4834_v60  ;;  %v1934_v17 = vrot.slane %v1920_v13, %v4834_v60  ;;  %v1911_v18 = vrot.slane %v1903_v14, %v4834_v60  ;;  %v1927_v19 = vrot.slane %v1919_v15, %v4834_v60 }
 0x655   : > { %v1937_v21 = vcombine.low %v1918_v16, %v1934_v17  ;;  %v1936_v22 = vcombine.high %v1911_v18, %v1927_v19  ;;  %v1938_v24 = vcombine.high %v1918_v16, %v1934_v17  ;;  %v1935_v25 = vcombine.low %v1911_v18, %v1927_v19 }
 0x657   : > { %1944 = vrot.lane.b32.xlu1 %v1937_v21, %s4608_s2  ;;  %1940 = vrot.lane.b32.xlu0 %v1936_v22, %s4609_s12  ;;  %v4106_v22 = vld [vmem:[%s5395_s19] ss:$0 sm:$0xff] }
 0x65b   : > { %1948 = vrot.lane.b32.xlu0 %v1938_v24, %s4610_s23 }
 0x6c9   : > { %v1941_v26 = vpop.permute.xlu0 %1940  ;;  %v1945_v27 = vpop.permute.xlu1 %1944 }
 0x6ca   : > { %v1951_v28 = vsel %vm1162_vm3, %v1935_v25, %v1941_v26 }
 0x6cb   : > { %v1953_v30 = vsel %vm1952_vm4, %v1951_v28, %v1945_v27 }
 0x6cd   : > { %v1949_v29 = vpop.permute.xlu0 %1948 }
 0x6ce   : > { %v1955_v31 = vsel %vm1954_vm5, %v1953_v30, %v1949_v29 }
 0x6cf   : > { %4316 = vmatmul.mubr.msk.f32.vlgmr.msra.gmra.mrb[6].mxu0 %vm607_vm1, %v1955_v31 }
 0x6d0   : > { %4345 = vmatprep.mubr.msk.f32.mxu0 %vm4599_vm2, %v4600_v23  ;;  %4465 = vmatpush3.bf16.msra.mxu0 %v4464_v62 }
 0x6d1   : > { %4466 = vmatprep.subr.bf16.mxu0 %v4598_v20 }
 0x6d4   : > { %4468 = vmatpush3.bf16.msra.mxu0 %v4467_v1 }
 0x6d5   : > { %4469 = vmatprep.subr.bf16.mxu0 %v4598_v20 }
 0x6d8   : > { %4471 = vmatpush3.bf16.msra.mxu0 %v4470_v4 }
 0x6d9   : > { %4472 = vmatprep.subr.bf16.mxu0 %v4598_v20 }
 0x6dc   : > { %4474 = vmatpush3.bf16.msra.mxu0 %v4473_v7 }
 0x6dd   : > { %4369 = vmatprep.subr.mxu0 %v4600_v23 }
 0x7a2   : > { %v2036_v34 = vpop.f32.mrb[6].mxu0 }
 0x7a3   : > { %v2037_v36 = vadd.f32 %v4100_v32, %v2036_v34  ;;  %v4317_v35 = vpop.f32.mrb[7].mxu0 }
 0x7a4   : > { %v4111_v35 = vld [vmem:[%s5353_s5 + $0x28] sm:$0xff] }
 0x7a5   : > { %v2040_v37 = vadd.f32 %v2037_v36, %v4789_v33  ;;  %v2072_v33 = vld [vmem:[%s5359_s11 + $0x10] sm:$0xff]  ;;  %v4110_v36 = vld [vmem:[%s5353_s5 + $0x20] sm:$0xff] }
 0x7a6   : > { %v4461_v52 = vpack.c.bf16 %v2073_v50, %v2072_v33  ;;  %v4109_v33 = vld [vmem:[%s5397_s15] ss:$0 sm:$0xff] }
 0x7a7   : > { %v2043_v41 = vsel %vm607_vm1, %v2040_v37, 0.0 }
 0x7a8   : > { %2044 = vadd.xlane.f32.xlu1 %v2043_v41  ;;  %4462 = vmatpush3.bf16.msra.mxu1 %v4461_v52  ;;  %v4112_v41 = vld [vmem:[%s5353_s5 + $0x30] sm:$0xff] }
 0x7a9   : > { %4475 = vmatprep.subr.bf16.mxu1 %v4598_v20 }
 0x835   : > { %v2045_v42 = vpop.xlane.xlu1 %2044 }
 0x836   : > { %v2046_v43 = vmul.f32 0.03125, %v2045_v42  ;;  %v4113_v42 = vld [vmem:[%s5353_s5 + $0x38] sm:$0xff] }
 0x838   : > { %v2047_v44 = vsub.f32 %v2040_v37, %v2046_v43  ;;  %v4476_v37 = vpack.c.bf16 %v4111_v35, %v4110_v36  ;;  %v4479_v43 = vpack.c.bf16 %v4113_v42, %v4112_v41 }
 0x83a   : > { %v2048_v45 = vmul.f32 %v2047_v44, %v2047_v44 }
 0x83c   : > { %v2049_v46 = vsel %vm607_vm1, %v2048_v45, 0.0 }
 0x83d   : > { %2050 = vadd.xlane.f32.xlu0 %v2049_v46 }
 0x8ca   : > { %v2051_v53 = vpop.xlane.xlu0 %2050 }
 0x8cb   : > { %v2052_v54 = vmul.f32 0.03125, %v2051_v53  ;;  %v4115_v53 = vld [vmem:[%s5354_s6 + $0x1] ss:$0 sm:$0xff] }
 0x8cd   : > { %v2053_v55 = vadd.f32 1e-12, %v2052_v54 }
 0x8cf   : > { %4547 = vrsqrt.f32 %v2053_v55 }
 0x8d9   : > { %v4548_v56 = vpop.eup %4547 }
 0x8da   : > { %v2055_v58 = vmul.f32 %v4548_v56, %v2047_v44 }
 0x8dc   : > { %v2062_v40 = vmul.f32 %v4102_v57, %v2055_v58 }
 0x8de   : > { %v2069_v59 = vadd.f32 %v4103_v39, %v2062_v40 }
 0x8e0   : > { %4327 = vmatmul.mubr.msk.f32.vlgmr.msra.gmra.mrb[12].mxu1 %vm607_vm1, %v2069_v59 }
 0x8e1   : > { %4356 = vmatprep.mubr.msk.f32.mxu1 %vm4599_vm2, %v4600_v23  ;;  %4477 = vmatpush3.bf16.msra.mxu1 %v4476_v37 }
 0x8e2   : > { %4478 = vmatprep.subr.bf16.mxu1 %v4598_v20 }
 0x8e5   : > { %4480 = vmatpush3.bf16.msra.mxu1 %v4479_v43 }
 0x8e6   : > { %4359 = vmatprep.subr.mxu1 %v4600_v23 }
 0x9b3   : > { %v2150_v9 = vpop.f32.mrb[12].mxu1 }
 0x9b4   : > { %v2151_v10 = vadd.f32 %v4104_v8, %v2150_v9  ;;  %v4328_v11 = vpop.f32.mrb[13].mxu1 }
 0x9b6   : > { %v2155_v12 = vmul.f32 0.044715, %v2151_v10  ;;  %v2154_v18 = vmul.f32 0.5, %v2151_v10 }
 0x9b8   : > { %v2156_v13 = vmul.f32 %v2155_v12, %v2151_v10 }
 0x9ba   : > { %v2157_v14 = vmul.f32 %v2156_v13, %v2151_v10 }
 0x9bc   : > { %v2158_v15 = vadd.f32 %v2157_v14, %v2151_v10 }
 0x9be   : > { %v2159_v16 = vmul.f32 0.7978846, %v2158_v15 }
 0x9c0   : > { %4549 = vtanh.f32 %v2159_v16 }
 0x9ca   : > { %v4550_v17 = vpop.eup %4549 }
 0x9cb   : > { %v2161_v19 = vadd.f32 1.0, %v4550_v17 }
 0x9cd   : > { %v2162_v21 = vmul.f32 %v2161_v19, %v2154_v18 }
 0x9cf   : > { %4346 = vmatmul.mubr.msk.f32.vlgmr.msra.gmra.mrb[8].mxu0 %vm2178_vm6, %v2162_v21 }
 0x9d0   : > { %4371 = vmatprep.mubr.msk.f32.mxu0 %vm4599_vm2, %v4600_v23 }
 0xaa2   : > { %v2248_v24 = vpop.f32.mrb[8].mxu0 }
 0xaa3   : > { %v2249_v25 = vadd.f32 %v4106_v22, %v2248_v24  ;;  %v4347_v26 = vpop.f32.mrb[9].mxu0 }
 0xaa5   : > { %v2252_v27 = vadd.f32 %v2249_v25, %v2069_v59 }
 0xaa7   : > { %v2255_v28 = vsel %vm607_vm1, %v2252_v27, 0.0 }
 0xaa8   : > { %2256 = vadd.xlane.f32.xlu0 %v2255_v28 }
 0xb35   : > { %v2257_v29 = vpop.xlane.xlu0 %2256 }
 0xb36   : > { %v2258_v30 = vmul.f32 0.03125, %v2257_v29 }
 0xb38   : > { %v2259_v31 = vsub.f32 %v2252_v27, %v2258_v30 }
 0xb3a   : > { %v2260_v32 = vmul.f32 %v2259_v31, %v2259_v31 }
 0xb3c   : > { %v2261_v34 = vsel %vm607_vm1, %v2260_v32, 0.0 }
 0xb3d   : > { %2262 = vadd.xlane.f32.xlu1 %v2261_v34 }
 0xbca   : > { %v2263_v44 = vpop.xlane.xlu1 %2262 }
 0xbcb   : > { %v2264_v45 = vmul.f32 0.03125, %v2263_v44 }
 0xbcd   : > { %v2265_v46 = vadd.f32 1e-12, %v2264_v45 }
 0xbcf   : > { %4551 = vrsqrt.f32 %v2265_v46 }
 0xbd9   : > { %v4552_v47 = vpop.eup %4551 }
 0xbda   : > { %v2267_v49 = vmul.f32 %v4552_v47, %v2259_v31 }
 0xbdc   : > { %v2274_v50 = vmul.f32 %v4108_v48, %v2267_v49 }
 0xbde   : > { %v5071_v52 = vadd.f32 %v4109_v33, %v2274_v50 }
 0xbe0   : > { %4357 = vmatmul.mubr.msk.f32.vlgmr.msra.gmra.mrb[14].mxu1 %vm607_vm1, %v5071_v52 }
 0xbe1   : > { %4361 = vmatprep.mubr.msk.f32.mxu1 %vm4599_vm2, %v4600_v23 }
 0xcb3   : > { %v2364_v54 = vpop.f32.mrb[14].mxu1 }
 0xcb4   : > { %v5080_v55 = vadd.f32 %v4115_v53, %v2364_v54  ;;  %v4358_v56 = vpop.f32.mrb[15].mxu1 }
 0xcb6   : > { %2372 = vrot.lane.b32.xlu1 %v5080_v55, %s4603_s24  ;;  %2369 = vrot.lane.b32.xlu0 %v5080_v55, %s4602_s1  ;;  %s5400_s1 = sld [smem:[#allocation16_spill]] }
 0xcba   : > { %2375 = vrot.lane.b32.xlu1 %v5080_v55, %s4601_s0  ;;  %2514 = vrot.lane.b32.xlu0 %v5080_v55, %s4604_s20 }
 0xd28   : > { %v5090_v57 = vpop.permute.xlu1 %2372  ;;  %v5092_v58 = vpop.permute.xlu0 %2369 }
 0xd29   : > { %2518 = vrot.lane.b32.xlu0 %v5090_v57, %s4604_s20  ;;  %2516 = vrot.lane.b32.xlu1 %v5092_v58, %s4604_s20  ;;  %v2378_v38 = vcombine.low %v5080_v55, %v5090_v57  ;;  %v2379_v61 = vcombine.high %v5080_v55, %v5090_v57 }
 0xd2b   : > { %v2386_v1 = vrot.slane %v2378_v38, %v4824_v51  ;;  %v2393_v2 = vrot.slane %v2379_v61, %v4824_v51 }
 0xd2c   : > { %v5098_v39 = vpop.permute.xlu1 %2375  ;;  %v2515_v0 = vpop.permute.xlu0 %2514 }
 0xd2d   : > { %2520 = vrot.lane.b32.xlu1 %v5098_v39, %s4604_s20  ;;  %v2394_v40 = vcombine.low %v5092_v58, %v5098_v39  ;;  %v2395_v59 = vcombine.high %v5092_v58, %v5098_v39 }
 0xd2f   : > { %v2402_v62 = vrot.slane %v2394_v40, %v4824_v51  ;;  %v2409_v63 = vrot.slane %v2395_v59, %v4824_v51 }
 0xd31   : > { %v2410_v3 = vcombine.low %v2386_v1, %v2402_v62  ;;  %v2411_v4 = vcombine.high %v2386_v1, %v2402_v62  ;;  %v2426_v5 = vcombine.low %v2393_v2, %v2409_v63  ;;  %v2427_v6 = vcombine.high %v2393_v2, %v2409_v63 }
 0xd33   : > { %v2418_v11 = vrot.slane %v2410_v3, %v4834_v60  ;;  %v2425_v12 = vrot.slane %v2411_v4, %v4834_v60  ;;  %v2434_v13 = vrot.slane %v2426_v5, %v4834_v60  ;;  %v2441_v14 = vrot.slane %v2427_v6, %v4834_v60 }
 0xd35   : > { %v2446_v24 = vcombine.low %v2418_v11, %v2425_v12  ;;  %v4117_v25 = vcombine.high %v2418_v11, %v2425_v12  ;;  %v2462_v26 = vcombine.low %v2434_v13, %v2441_v14  ;;  %v4118_v27 = vcombine.high %v2434_v13, %v2441_v14 }
 0xd37   : > { %v2453_v37 = vrot.slane %v2446_v24, %v4824_v51  ;;  %v2461_v41 = vrot.slane %v4117_v25, %v4824_v51  ;;  %v2469_v42 = vrot.slane %v2462_v26, %v4824_v51  ;;  %v2477_v43 = vrot.slane %v4118_v27, %v4824_v51 }
 0xd39   : > { %v2478_v53 = vcombine.low %v2453_v37, %v2461_v41  ;;  %v2494_v54 = vcombine.low %v2469_v42, %v2477_v43  ;;  %v2479_v56 = vcombine.high %v2453_v37, %v2461_v41  ;;  %v2495_v40 = vcombine.high %v2469_v42, %v2477_v43 }
 0xd3b   : > { %v2486_v3 = vrot.slane %v2478_v53, %v4834_v60  ;;  %v2502_v4 = vrot.slane %v2494_v54, %v4834_v60  ;;  %v2493_v5 = vrot.slane %v2479_v56, %v4834_v60  ;;  %v2509_v6 = vrot.slane %v2495_v40, %v4834_v60 }
 0xd3d   : > { %v2511_v12 = vcombine.high %v2486_v3, %v2502_v4  ;;  %v2513_v14 = vcombine.high %v2493_v5, %v2509_v6 }
 0xd9b   : > { %v2517_v7 = vpop.permute.xlu1 %2516  ;;  %v2519_v8 = vpop.permute.xlu0 %2518 }
 0xd9c   : > { %v2526_v9 = vcombine.low %v2515_v0, %v2519_v8  ;;  %v2527_v10 = vcombine.high %v2515_v0, %v2519_v8 }
 0xd9e   : > { %v2534_v18 = vrot.slane %v2526_v9, %v4824_v51  ;;  %v2541_v19 = vrot.slane %v2527_v10, %v4824_v51  ;;  %v2510_v9 = vcombine.low %v2486_v3, %v2502_v4  ;;  %v2512_v10 = vcombine.low %v2493_v5, %v2509_v6 }
 0xd9f   : > { %v2521_v15 = vpop.permute.xlu1 %2520 }
 0xda0   : > { %v2542_v16 = vcombine.low %v2517_v7, %v2521_v15  ;;  %v2543_v17 = vcombine.high %v2517_v7, %v2521_v15 }
 0xda2   : > { %v2550_v21 = vrot.slane %v2542_v16, %v4824_v51  ;;  %v2557_v22 = vrot.slane %v2543_v17, %v4824_v51 }
 0xda4   : > { %v2558_v28 = vcombine.low %v2534_v18, %v2550_v21  ;;  %v2559_v29 = vcombine.high %v2534_v18, %v2550_v21  ;;  %v2574_v30 = vcombine.low %v2541_v19, %v2557_v22  ;;  %v2575_v31 = vcombine.high %v2541_v19, %v2557_v22 }
 0xda6   : > { %v2566_v32 = vrot.slane %v2558_v28, %v4834_v60  ;;  %v2573_v34 = vrot.slane %v2559_v29, %v4834_v60  ;;  %v2582_v36 = vrot.slane %v2574_v30, %v4834_v60  ;;  %v2589_v35 = vrot.slane %v2575_v31, %v4834_v60 }
 0xda8   : > { %v2594_v44 = vcombine.low %v2566_v32, %v2573_v34  ;;  %v4119_v45 = vcombine.high %v2566_v32, %v2573_v34  ;;  %v2610_v46 = vcombine.low %v2582_v36, %v2589_v35  ;;  %v4120_v47 = vcombine.high %v2582_v36, %v2589_v35 }
 0xdaa   : > { %v2601_v48 = vrot.slane %v2594_v44, %v4824_v51  ;;  %v2609_v49 = vrot.slane %v4119_v45, %v4824_v51  ;;  %v2617_v33 = vrot.slane %v2610_v46, %v4824_v51  ;;  %v2625_v50 = vrot.slane %v4120_v47, %v4824_v51 }
 0xdac   : > { %v2626_v59 = vcombine.low %v2601_v48, %v2609_v49  ;;  %v2627_v38 = vcombine.high %v2601_v48, %v2609_v49  ;;  %v2642_v61 = vcombine.low %v2617_v33, %v2625_v50  ;;  %v2643_v62 = vcombine.high %v2617_v33, %v2625_v50 }
 0xdae   : > { %v2634_v63 = vrot.slane %v2626_v59, %v4834_v60  ;;  %v2650_v0 = vrot.slane %v2642_v61, %v4834_v60  ;;  %v2641_v1 = vrot.slane %v2627_v38, %v4834_v60  ;;  %v2657_v2 = vrot.slane %v2643_v62, %v4834_v60 }
 0xdb0   : > { %v2658_v7 = vcombine.low %v2634_v63, %v2650_v0  ;;  %v2660_v8 = vcombine.low %v2641_v1, %v2657_v2  ;;  %v2659_v11 = vcombine.high %v2634_v63, %v2650_v0  ;;  %v2661_v13 = vcombine.high %v2641_v1, %v2657_v2 }
 0xdb2   : > { %4360 = vmatpush3.xpose.msk.msra.mxu1 %vm1162_vm3, %v2658_v7  ;;  %4370 = vmatpush3.xpose.msk.msra.mxu0 %vm1162_vm3, %v2660_v8 }
 0xdb3   : > { %4364 = vmatprep.subr.mxu1 %v4600_v23  ;;  %4379 = vmatprep.subr.mxu0 %v4600_v23 }
 0xdb5   : > { %4362 = vmatmul.mubr.msk.f32.vlgmr.msra.gmra.mrb[16].mxu1 %vm1162_vm3, %v2510_v9  ;;  %4372 = vmatmul.mubr.msk.f32.vlgmr.msra.gmra.mrb[10].mxu0 %vm1162_vm3, %v2512_v10 }
 0xdb6   : > { %4365 = vmatpush3.xpose.msk.msra.mxu1 %vm1162_vm3, %v2659_v11  ;;  %4366 = vmatprep.mubr.msk.f32.mxu1 %vm4599_vm2, %v4600_v23 }
 0xdb7   : > { %4374 = vmatprep.subr.mxu1 %v4600_v23  ;;  %4381 = vmatprep.mubr.msk.f32.mxu0 %vm4599_vm2, %v4600_v23 }
 0xdb9   : > { %4367 = vmatmul.mubr.msk.f32.vlgmr.msra.gmra.mrb[18].mxu1 %vm1162_vm3, %v2511_v12 }
 0xdba   : > { %4375 = vmatpush3.xpose.msk.msra.mxu1 %vm1162_vm3, %v2661_v13  ;;  %4376 = vmatprep.mubr.msk.f32.mxu1 %vm4599_vm2, %v4600_v23 }
 0xdbb   : > { %4384 = vmatprep.subr.mxu1 %v4600_v23 }
 0xdbd   : > { %4377 = vmatmul.mubr.msk.f32.vlgmr.msra.gmra.mrb[20].mxu1 %vm1162_vm3, %v2513_v14 }
 0xdbe   : > { %4386 = vmatprep.mubr.msk.f32.mxu1 %vm4599_vm2, %v4600_v23 }
 0xe88   : > { %v2882_v15 = vpop.f32.mrb[16].mxu1  ;;  %v3034_v16 = vpop.f32.mrb[10].mxu0 }
 0xe89   : > { %v4363_v17 = vpop.f32.mrb[17].mxu1  ;;  %v4373_v18 = vpop.f32.mrb[11].mxu0  ;;  %v3114_v19 = vsel %vm1162_vm3, %v2882_v15, -inf  ;;  %v3120_v24 = vsel %vm1162_vm3, %v3034_v16, -inf }
 0xe8a   : > { %3115 = vmax.xlane.f32.xlu0 %v3114_v19 }
 0xe8c   : > { %v2958_v21 = vpop.f32.mrb[18].mxu1 }
 0xe8d   : > { %v4368_v22 = vpop.f32.mrb[19].mxu1  ;;  %v3117_v25 = vsel %vm1162_vm3, %v2958_v21, -inf }
 0xe8e   : > { %3121 = vmax.xlane.f32.xlu0 %v3120_v24  ;;  %3118 = vmax.xlane.f32.xlu1 %v3117_v25 }
 0xe90   : > { %v3110_v26 = vpop.f32.mrb[20].mxu1 }
 0xe91   : > { %v4378_v27 = vpop.f32.mrb[21].mxu1  ;;  %v3123_v28 = vsel %vm1162_vm3, %v3110_v26, -inf }
 0xe92   : > { %3124 = vmax.xlane.f32.xlu0 %v3123_v28 }
 0xe9f   : > { %2662 = vrot.lane.b32.xlu1 %v5080_v55, %s4607_s3 }
 0xf17   : > { %v3116_v29 = vpop.xlane.xlu0 %3115 }
 0xf18   : > { %v3126_v30 = vsub.f32 %v2882_v15, %v3116_v29 }
 0xf1a   : > { %v3130_v31 = vmul.f32 1.442695, %v3126_v30 }
 0xf1b   : > { %v3122_v32 = vpop.xlane.xlu0 %3121  ;;  %v3119_v34 = vpop.xlane.xlu1 %3118 }
 0xf1c   : > { %4553 = vpow2.f32 %v3130_v31  ;;  %v3128_v36 = vsub.f32 %v3034_v16, %v3122_v32  ;;  %v3127_v35 = vsub.f32 %v2958_v21, %v3119_v34 }
 0xf1e   : > { %v3134_v37 = vmul.f32 1.442695, %v3128_v36  ;;  %v3132_v41 = vmul.f32 1.442695, %v3127_v35 }
 0xf1f   : > { %v3125_v42 = vpop.xlane.xlu0 %3124  ;;  %v2663_v53 = vpop.permute.xlu1 %2662 }
 0xf20   : > { %4555 = vpow2.f32 %v3134_v37  ;;  %v3129_v43 = vsub.f32 %v3110_v26, %v3125_v42 }
 0xf21   : > { %4557 = vpow2.f32 %v3132_v41 }
 0xf22   : > { %v3136_v44 = vmul.f32 1.442695, %v3129_v43 }
 0xf24   : > { %4559 = vpow2.f32 %v3136_v44 }
 0xf26   : > { %v5168_v45 = vpop.eup %4553 }
 0xf27   : > { %v3138_v55 = vsel %vm1162_vm3, %v5168_v45, 0.0 }
 0xf28   : > { %3139 = vadd.xlane.f32.xlu1 %v3138_v55 }
 0xf2a   : > { %v5172_v46 = vpop.eup %4555 }
 0xf2b   : > { %v4558_v47 = vpop.eup %4557  ;;  %v3144_v48 = vsel %vm1162_vm3, %v5172_v46, 0.0 }
 0xf2c   : > { %3145 = vadd.xlane.f32.xlu1 %v3144_v48  ;;  %v3141_v49 = vsel %vm1162_vm3, %v4558_v47, 0.0 }
 0xf2d   : > { %3142 = vadd.xlane.f32.xlu0 %v3141_v49 }
 0xf2e   : > { %v5177_v33 = vpop.eup %4559 }
 0xf2f   : > { %v3147_v50 = vsel %vm1162_vm3, %v5177_v33, 0.0 }
 0xf31   : > { %3148 = vadd.xlane.f32.xlu0 %v3147_v50 }
 0xf3d   : > { %2666 = vrot.lane.b32.xlu1 %v5090_v57, %s4607_s3 }
 0xf41   : > { %2668 = vrot.lane.b32.xlu1 %v5098_v39, %s4607_s3 }
 0xf47   : > { %2664 = vrot.lane.b32.xlu0 %v5092_v58, %s4607_s3 }
 0xfb5   : > { %v3140_v54 = vpop.xlane.xlu1 %3139 }
 0xfb6   : > { %4561 = vrcp.f32 %v3140_v54 }
 0xfb9   : > { %v3146_v56 = vpop.xlane.xlu1 %3145 }
 0xfba   : > { %v3143_v40 = vpop.xlane.xlu0 %3142 }
 0xfbb   : > { %4563 = vrcp.f32 %v3143_v40 }
 0xfbc   : > { %4565 = vrcp.f32 %v3146_v56 }
 0xfbd   : > { %v2667_v59 = vpop.permute.xlu1 %2666 }
 0xfbe   : > { %v3149_v38 = vpop.xlane.xlu0 %3148  ;;  %v2674_v61 = vcombine.low %v2663_v53, %v2667_v59  ;;  %v2675_v62 = vcombine.high %v2663_v53, %v2667_v59 }
 0xfbf   : > { %4567 = vrcp.f32 %v3149_v38 }
 0xfc0   : > { %v2682_v57 = vrot.slane %v2674_v61, %v4824_v51  ;;  %v2689_v39 = vrot.slane %v2675_v62, %v4824_v51  ;;  %v4562_v21 = vpop.eup %4561 }
 0xfc1   : > { %v2669_v63 = vpop.permute.xlu1 %2668  ;;  %v3154_v37 = vmul.f32 %v4562_v21, %v5168_v45  ;;  %v4137_v45 = vld [vmem:[%s5355_s7 + $0x20] sm:$0xff] }
 0xfc2   : > { %v2665_v0 = vpop.permute.xlu0 %2664 }
 0xfc3   : > { %v2690_v1 = vcombine.low %v2665_v0, %v2669_v63  ;;  %v2691_v2 = vcombine.high %v2665_v0, %v2669_v63 }
 0xfc5   : > { %v2698_v3 = vrot.slane %v2690_v1, %v4824_v51  ;;  %v2705_v58 = vrot.slane %v2691_v2, %v4824_v51  ;;  %v4564_v27 = vpop.eup %4563 }
 0xfc6   : > { %v4566_v30 = vpop.eup %4565  ;;  %v3155_v41 = vmul.f32 %v4564_v27, %v4558_v47 }
 0xfc7   : > { %v2706_v4 = vcombine.low %v2682_v57, %v2698_v3  ;;  %v2707_v5 = vcombine.high %v2682_v57, %v2698_v3  ;;  %v2722_v6 = vcombine.low %v2689_v39, %v2705_v58  ;;  %v2723_v7 = vcombine.high %v2689_v39, %v2705_v58 }
 0xfc8   : > { %v3156_v44 = vmul.f32 %v4566_v30, %v5172_v46  ;;  %v4138_v46 = vld [vmem:[%s5355_s7 + $0x28] sm:$0xff] }
 0xfc9   : > { %v2714_v8 = vrot.slane %v2706_v4, %v4834_v60  ;;  %v2721_v9 = vrot.slane %v2707_v5, %v4834_v60  ;;  %v2730_v10 = vrot.slane %v2722_v6, %v4834_v60  ;;  %v2737_v11 = vrot.slane %v2723_v7, %v4834_v60  ;;  %v4568_v35 = vpop.eup %4567  ;;  %v4139_v4 = vld [vmem:[%s5355_s7 + $0x30] sm:$0xff]  ;;  %v4140_v5 = vld [vmem:[%s5355_s7 + $0x38] sm:$0xff] }
 0xfca   : > { %v3157_v55 = vmul.f32 %v4568_v35, %v5177_v33  ;;  %v4482_v47 = vpack.c.bf16 %v4138_v46, %v4137_v45 }
 0xfcb   : > { %v2742_v12 = vcombine.low %v2714_v8, %v2721_v9  ;;  %v4121_v13 = vcombine.high %v2714_v8, %v2721_v9  ;;  %v2758_v14 = vcombine.low %v2730_v10, %v2737_v11  ;;  %v4122_v15 = vcombine.high %v2730_v10, %v2737_v11 }
 0xfcc   : > { %v4485_v10 = vpack.c.bf16 %v4140_v5, %v4139_v4  ;;  %v4157_v4 = vld [vmem:[%s5361_s13 + $0x50] sm:$0xff]  ;;  %v4158_v5 = vld [vmem:[%s5361_s13 + $0x58] sm:$0xff] }
 0xfcd   : > { %v2749_v16 = vrot.slane %v2742_v12, %v4824_v51  ;;  %v2757_v17 = vrot.slane %v4121_v13, %v4824_v51  ;;  %v2765_v18 = vrot.slane %v2758_v14, %v4824_v51  ;;  %v2773_v19 = vrot.slane %v4122_v15, %v4824_v51 }
 0xfcf   : > { %v2774_v22 = vcombine.low %v2749_v16, %v2757_v17  ;;  %v2790_v24 = vcombine.low %v2765_v18, %v2773_v19  ;;  %v2775_v25 = vcombine.high %v2749_v16, %v2757_v17  ;;  %v2791_v26 = vcombine.high %v2765_v18, %v2773_v19 }
 0xfd1   : > { %v2782_v28 = vrot.slane %v2774_v22, %v4834_v60  ;;  %v2798_v29 = vrot.slane %v2790_v24, %v4834_v60  ;;  %v2789_v31 = vrot.slane %v2775_v25, %v4834_v60  ;;  %v2805_v32 = vrot.slane %v2791_v26, %v4834_v60 }
 0xfd3   : > { %v2806_v34 = vcombine.low %v2782_v28, %v2798_v29  ;;  %v2807_v36 = vcombine.high %v2782_v28, %v2798_v29  ;;  %v2808_v42 = vcombine.low %v2789_v31, %v2805_v32  ;;  %v2809_v43 = vcombine.high %v2789_v31, %v2805_v32 }
 0xfd5   : > { %4380 = vmatpush3.msra.mxu0 %v2806_v34  ;;  %4385 = vmatpush3.msra.mxu1 %v2807_v36 }
 0xfd6   : > { %4382 = vmatmul.mubr.msk.f32.vlgmr.msra.gmra.mrb[12].mxu0 %vm1162_vm3, %v3154_v37  ;;  %4387 = vmatmul.mubr.msk.f32.vlgmr.msra.gmra.mrb[22].mxu1 %vm1162_vm3, %v3155_v41 }
 0xfd7   : > { %4389 = vmatprep.subr.mxu0 %v4600_v23  ;;  %4394 = vmatprep.subr.mxu1 %v4600_v23 }
 0xfd8   : > { %4390 = vmatpush3.msra.mxu0 %v2808_v42  ;;  %4395 = vmatpush3.msra.mxu1 %v2809_v43 }
 0xfd9   : > { %4391 = vmatprep.mubr.msk.f32.mxu0 %vm4599_vm2, %v4600_v23  ;;  %4396 = vmatprep.mubr.msk.f32.mxu1 %vm4599_vm2, %v4600_v23 }
 0xfda   : > { %4392 = vmatmul.mubr.msk.f32.vlgmr.msra.gmra.mrb[14].mxu0 %vm1162_vm3, %v3156_v44  ;;  %4397 = vmatmul.mubr.msk.f32.vlgmr.msra.gmra.mrb[24].mxu1 %vm1162_vm3, %v3157_v55 }
 0xfdb   : > { %4481 = vmatprep.subr.bf16.mxu0 %v4598_v20  ;;  %4407 = vmatprep.mubr.msk.f32.mxu0 %vm4599_vm2, %v4600_v23 }
 0xfdc   : > { %4487 = vmatprep.subr.bf16.mxu1 %v4598_v20  ;;  %4418 = vmatprep.mubr.msk.f32.mxu1 %vm4599_vm2, %v4600_v23 }
 0xfdd   : > { %4483 = vmatpush3.bf16.msra.mxu0 %v4482_v47 }
 0xfde   : > { %4484 = vmatprep.subr.bf16.mxu0 %v4598_v20 }
 0xfe1   : > { %4486 = vmatpush3.bf16.msra.mxu0 %v4485_v10  ;;  %v4162_v10 = vld [vmem:[%s5361_s13 + $0x78] sm:$0xff] }
 0xfe2   : > { %4493 = vmatprep.subr.bf16.mxu0 %v4598_v20 }
0x10a9   : > { %v3227_v48 = vpop.f32.mrb[12].mxu0  ;;  %v3300_v49 = vpop.f32.mrb[22].mxu1 }
0x10aa   : > { %v4383_v33 = vpop.f32.mrb[13].mxu0  ;;  %v4388_v50 = vpop.f32.mrb[23].mxu1 }
0x10ab   : > { %v4148_v50 = vld [vmem:[%s5359_s11 + $0x20] sm:$0xff] }
0x10ad   : > { %v3373_v53 = vpop.f32.mrb[14].mxu0  ;;  %v3446_v54 = vpop.f32.mrb[24].mxu1 }
0x10ae   : > { %v3450_v56 = vcombine.low %v3227_v48, %v3373_v53  ;;  %v3451_v40 = vcombine.high %v3227_v48, %v3373_v53  ;;  %v3466_v59 = vcombine.low %v3300_v49, %v3446_v54  ;;  %v3467_v38 = vcombine.high %v3300_v49, %v3446_v54  ;;  %v4393_v61 = vpop.f32.mrb[15].mxu0  ;;  %v4398_v62 = vpop.f32.mrb[25].mxu1  ;;  %v4149_v53 = vld [vmem:[%s5359_s11 + $0x28] sm:$0xff] }
0x10af   : > { %v4488_v54 = vpack.c.bf16 %v4149_v53, %v4148_v50 }
0x10b0   : > { %v3458_v63 = vrot.slane %v3450_v56, %v4824_v51  ;;  %v3465_v0 = vrot.slane %v3451_v40, %v4824_v51  ;;  %v3474_v1 = vrot.slane %v3466_v59, %v4824_v51  ;;  %v3481_v2 = vrot.slane %v3467_v38, %v4824_v51  ;;  %v4151_v56 = vld [vmem:[%s5359_s11 + $0x38] sm:$0xff] }
0x10b1   : > { %4489 = vmatpush3.bf16.msra.mxu1 %v4488_v54 }
0x10b2   : > { %v3482_v57 = vcombine.low %v3458_v63, %v3474_v1  ;;  %v3483_v39 = vcombine.high %v3458_v63, %v3474_v1  ;;  %v3498_v3 = vcombine.low %v3465_v0, %v3481_v2  ;;  %v3499_v58 = vcombine.high %v3465_v0, %v3481_v2  ;;  %4490 = vmatprep.subr.bf16.mxu1 %v4598_v20  ;;  %v4146_v63 = vld [vmem:[%s5357_s9 + $0x1] ss:$0 sm:$0xff] }
0x10b3   : > { %v4147_v1 = vld [vmem:[%s5358_s10 + $0x1] ss:$0 sm:$0xff] }
0x10b4   : > { %v3490_v6 = vrot.slane %v3482_v57, %v4834_v60  ;;  %v3497_v7 = vrot.slane %v3483_v39, %v4834_v60  ;;  %v3506_v8 = vrot.slane %v3498_v3, %v4834_v60  ;;  %v3513_v9 = vrot.slane %v3499_v58, %v4834_v60  ;;  %v4155_v39 = vld [vmem:[%s5361_s13 + $0x40] sm:$0xff]  ;;  %v4156_v3 = vld [vmem:[%s5361_s13 + $0x48] sm:$0xff] }
0x10b5   : > { %v4494_v58 = vpack.c.bf16 %v4156_v3, %v4155_v39 }
0x10b6   : > { %v3518_v11 = vcombine.low %v3490_v6, %v3497_v7  ;;  %v4135_v12 = vcombine.high %v3490_v6, %v3497_v7  ;;  %v3534_v13 = vcombine.low %v3506_v8, %v3513_v9  ;;  %v4136_v14 = vcombine.high %v3506_v8, %v3513_v9  ;;  %v4160_v7 = vld [vmem:[%s5361_s13 + $0x68] sm:$0xff]  ;;  %v4161_v9 = vld [vmem:[%s5361_s13 + $0x70] sm:$0xff] }
0x10b7   : > { %v4497_v6 = vpack.c.bf16 %v4158_v5, %v4157_v4 }
0x10b8   : > { %v3525_v15 = vrot.slane %v3518_v11, %v4824_v51  ;;  %v3533_v16 = vrot.slane %v4135_v12, %v4824_v51  ;;  %v3541_v17 = vrot.slane %v3534_v13, %v4824_v51  ;;  %v3549_v18 = vrot.slane %v4136_v14, %v4824_v51  ;;  %v4153_v12 = vld [vmem:[%s5394_s16 + $0x1] ss:$0 sm:$0xff] }
0x10b9   : > { %v4503_v11 = vpack.c.bf16 %v4162_v10, %v4161_v9 }
0x10ba   : > { %v3551_v19 = vcombine.high %v3525_v15, %v3533_v16  ;;  %v3567_v21 = vcombine.high %v3541_v17, %v3549_v18  ;;  %v3550_v22 = vcombine.low %v3525_v15, %v3533_v16  ;;  %v3566_v24 = vcombine.low %v3541_v17, %v3549_v18 }
0x10bc   : > { %v3565_v25 = vrot.slane %v3551_v19, %v4834_v60  ;;  %v3581_v26 = vrot.slane %v3567_v21, %v4834_v60  ;;  %v3558_v27 = vrot.slane %v3550_v22, %v4834_v60  ;;  %v3574_v28 = vrot.slane %v3566_v24, %v4834_v60  ;;  %v4142_v60 = vld [vmem:[%s5356_s8 + $0x1] ss:$0 sm:$0xff] }
0x10be   : > { %v3584_v29 = vcombine.low %v3565_v25, %v3581_v26  ;;  %v3583_v30 = vcombine.high %v3558_v27, %v3574_v28  ;;  %v3585_v31 = vcombine.high %v3565_v25, %v3581_v26  ;;  %v3582_v32 = vcombine.low %v3558_v27, %v3574_v28 }
0x10c0   : > { %3591 = vrot.lane.b32.xlu1 %v3584_v29, %s4608_s2  ;;  %3587 = vrot.lane.b32.xlu0 %v3583_v30, %s4609_s12  ;;  %s5398_s12 = sld [smem:[#allocation17_spill]] }
0x10c4   : > { %3595 = vrot.lane.b32.xlu0 %v3585_v31, %s4610_s23  ;;  %s5399_s23 = sld [smem:[#allocation7_spill]] }
0x10ca   : > { %p557_p8 = scmp.lt.s32.totalorder %s5399_s23, 1 }
0x10cc   : > { %s5404_s23 = smov (!%p557_p8, %s5399_s23), 1 }
0x10cd   : > { %s4074_s24 = sshll.u32 %s5404_s23, 1 }
0x10ce   : > { %s560_s21 = scalar_lea.vmem %s5401_s26, %s4074_s24 }
0x1132   : > { %v3588_v51 = vpop.permute.xlu0 %3587  ;;  %v3592_v34 = vpop.permute.xlu1 %3591 }
0x1133   : > { %v3598_v36 = vsel %vm1162_vm3, %v3582_v32, %v3588_v51 }
0x1134   : > { %v3599_v37 = vsel %vm1952_vm4, %v3598_v36, %v3592_v34 }
0x1136   : > { %v3596_v35 = vpop.permute.xlu0 %3595 }
0x1137   : > { %v3600_v41 = vsel %vm1954_vm5, %v3599_v37, %v3596_v35  ;;  %v3937_v37 = vld [vmem:[%s5398_s12] sm:$0x3] }
0x1138   : > { %4408 = vmatmul.mubr.msk.f32.vlgmr.msra.gmra.mrb[16].mxu0 %vm607_vm1, %v3600_v41  ;;  %v4611_v41 = vmov 0  }
0x1139   : > { %4437 = vmatprep.mubr.msk.f32.mxu0 %vm4599_vm2, %v4600_v23  ;;  %4495 = vmatpush3.bf16.msra.mxu0 %v4494_v58 }
0x113a   : > { %4496 = vmatprep.subr.bf16.mxu0 %v4598_v20  ;;  %4528 = vset.pattern.permute.xlu0 %v4611_v41 }
0x113d   : > { %4498 = vmatpush3.bf16.msra.mxu0 %v4497_v6 }
0x113e   : > { %4499 = vmatprep.subr.bf16.mxu0 %v4598_v20 }
0x120b   : > { %v3683_v42 = vpop.f32.mrb[16].mxu0 }
0x120c   : > { %v3684_v43 = vadd.f32 %v4142_v60, %v3683_v42  ;;  %v4409_v44 = vpop.f32.mrb[17].mxu0 }
0x120e   : > { %v3687_v55 = vadd.f32 %v3684_v43, %v5071_v52  ;;  %v4150_v52 = vld [vmem:[%s5359_s11 + $0x30] sm:$0xff] }
0x120f   : > { %v4491_v40 = vpack.c.bf16 %v4151_v56, %v4150_v52 }
0x1210   : > { %v3692_v45 = vsel %vm607_vm1, %v3687_v55, 0.0 }
0x1211   : > { %3693 = vadd.xlane.f32.xlu1 %v3692_v45  ;;  %4492 = vmatpush3.bf16.msra.mxu1 %v4491_v40 }
0x1212   : > { %4440 = vmatprep.subr.mxu1 %v4600_v23 }
0x129e   : > { %v3694_v46 = vpop.xlane.xlu1 %3693 }
0x129f   : > { %v3695_v47 = vmul.f32 0.03125, %v3694_v46  ;;  %v4169_v46 = vld [vmem:[%s5397_s15 + $0x1] ss:$0 sm:$0xff] }
0x12a1   : > { %v3696_v48 = vsub.f32 %v3687_v55, %v3695_v47  ;;  %v4168_v55 = vld [vmem:[%s5396_s30 + $0x1] ss:$0 sm:$0xff] }
0x12a3   : > { %v3697_v49 = vmul.f32 %v3696_v48, %v3696_v48 }
0x12a5   : > { %v3698_v33 = vsel %vm607_vm1, %v3697_v49, 0.0  ;;  %v3936_v49 = vld [vmem:[%s5400_s1] sm:$0x3] }
0x12a6   : > { %3699 = vadd.xlane.f32.xlu0 %v3698_v33 }
0x1333   : > { %v3700_v59 = vpop.xlane.xlu0 %3699 }
0x1334   : > { %v3701_v38 = vmul.f32 0.03125, %v3700_v59 }
0x1336   : > { %v3702_v61 = vadd.f32 1e-12, %v3701_v38 }
0x1338   : > { %4569 = vrsqrt.f32 %v3702_v61 }
0x1342   : > { %v4570_v62 = vpop.eup %4569 }
0x1343   : > { %v3704_v0 = vmul.f32 %v4570_v62, %v3696_v48 }
0x1345   : > { %v3711_v2 = vmul.f32 %v4146_v63, %v3704_v0 }
0x1347   : > { %v3718_v57 = vadd.f32 %v4147_v1, %v3711_v2 }
0x1349   : > { %4419 = vmatmul.mubr.msk.f32.vlgmr.msra.gmra.mrb[26].mxu1 %vm607_vm1, %v3718_v57 }
0x134a   : > { %4442 = vmatprep.mubr.msk.f32.mxu1 %vm4599_vm2, %v4600_v23  ;;  %v4159_v23 = vld [vmem:[%s5361_s13 + $0x60] sm:$0xff] }
0x134b   : > { %v4500_v8 = vpack.c.bf16 %v4160_v7, %v4159_v23 }
0x134d   : > { %4501 = vmatpush3.bf16.msra.mxu0 %v4500_v8 }
0x134e   : > { %4502 = vmatprep.subr.bf16.mxu0 %v4598_v20  ;;  %v4164_v20 = vld [vmem:[%s5395_s19 + $0x1] ss:$0 sm:$0xff] }
0x1351   : > { %4504 = vmatpush3.bf16.msra.mxu0 %v4503_v11 }
0x141c   : > { %v3801_v13 = vpop.f32.mrb[26].mxu1 }
0x141d   : > { %v3802_v14 = vadd.f32 %v4153_v12, %v3801_v13  ;;  %v4420_v15 = vpop.f32.mrb[27].mxu1 }
0x141f   : > { %v3806_v16 = vmul.f32 0.044715, %v3802_v14  ;;  %v3805_v24 = vmul.f32 0.5, %v3802_v14 }
0x1421   : > { %v3807_v17 = vmul.f32 %v3806_v16, %v3802_v14 }
0x1423   : > { %v3808_v18 = vmul.f32 %v3807_v17, %v3802_v14 }
0x1425   : > { %v3809_v19 = vadd.f32 %v3808_v18, %v3802_v14 }
0x1427   : > { %v3810_v21 = vmul.f32 0.7978846, %v3809_v19 }
0x1429   : > { %4571 = vtanh.f32 %v3810_v21 }
0x1433   : > { %v4572_v22 = vpop.eup %4571 }
0x1434   : > { %v3812_v25 = vadd.f32 1.0, %v4572_v22 }
0x1436   : > { %v3813_v26 = vmul.f32 %v3812_v25, %v3805_v24 }
0x1438   : > { %4438 = vmatmul.mubr.msk.f32.vlgmr.msra.gmra.mrb[18].mxu0 %vm2178_vm6, %v3813_v26 }
0x150b   : > { %v3900_v27 = vpop.f32.mrb[18].mxu0 }
0x150c   : > { %v3901_v28 = vadd.f32 %v4164_v20, %v3900_v27  ;;  %v4439_v29 = vpop.f32.mrb[19].mxu0 }
0x150e   : > { %v3904_v30 = vadd.f32 %v3901_v28, %v3718_v57 }
0x1510   : > { %v3909_v31 = vsel %vm607_vm1, %v3904_v30, 0.0 }
0x1511   : > { %3910 = vadd.xlane.f32.xlu0 %v3909_v31 }
0x1527   : > { %3940 = vperm.xlu0 %4528, %v3937_v37  }
0x159e   : > { %v3911_v32 = vpop.xlane.xlu0 %3910 }
0x159f   : > { %v3912_v51 = vmul.f32 0.03125, %v3911_v32 }
0x15a1   : > { %v3913_v34 = vsub.f32 %v3904_v30, %v3912_v51 }
0x15a3   : > { %v3914_v36 = vmul.f32 %v3913_v34, %v3913_v34 }
0x15a5   : > { %v3915_v35 = vsel %vm607_vm1, %v3914_v36, 0.0 }
0x15a6   : > { %3916 = vadd.xlane.f32.xlu1 %v3915_v35  ;;  %v3941_v33 = vpop.permute.xlu0 %3940 }
0x1633   : > { %v3917_v60 = vpop.xlane.xlu1 %3916 }
0x1634   : > { %v3918_v42 = vmul.f32 0.03125, %v3917_v60 }
0x1636   : > { %v3919_v43 = vadd.f32 1e-12, %v3918_v42 }
0x1638   : > { %4573 = vrsqrt.f32 %v3919_v43 }
0x1642   : > { %v4574_v44 = vpop.eup %4573 }
0x1643   : > { %v3921_v45 = vmul.f32 %v4574_v44, %v3913_v34 }
0x1645   : > { %v3928_v47 = vmul.f32 %v4168_v55, %v3921_v45 }
0x1647   : > { %v3935_v48 = vadd.f32 %v4169_v46, %v3928_v47 }
0x1649   : > { %4441 = vmatpush3.xpose.msk.msra.mxu1 %vm607_vm1, %v3935_v48 }
0x164c   : > { %4443 = vmatmul.mubr.msk.f32.vlgmr.msra.gmra.mrb[28].mxu1 %vm607_vm1, %v3936_v49 }
0x171f   : > { %v4015_v50 = vpop.f32.mrb[28].mxu1 }
0x1720   : > { %v4016_v53 = vadd.f32 %v4015_v50, %v3941_v33  ;;  %v4444_v54 = vpop.f32.mrb[29].mxu1 }
0x1722   : > { %4020 = vst.msk [vmem:[%s560_s21] sm:$0x3] %vm4019_vm7, %v4016_v53 }
0x1723 PF: > { %s5402_s28 = sld [smem:[#allocation6_spill]] }
0x1729   : > { %s35_s22 = sadd.s32 1, %s5402_s28  }
0x172a   : > { %p32_p9 = scmp.ge.s32.totalorder %s35_s22, 4  }
0x172c   :  { %34 = sbr.rel (!%p32_p9) target bundleno = 25 (0x19), region = 139 }

</bundles_post_ra>
